<compile_context>
chip_gen: v7x
topology: tpu7x:2x2x1
jax: 0.10.0
libtpu: 0.0.40
codegen_flags: <defaults>
</compile_context>

<pallas_src>
import functools
import math

import jax
import jax.numpy as jnp
from jax.experimental import pallas as pl
from jax.experimental.pallas import tpu as pltpu


# --------------------------------------------------------------------------- #
# fused kernel: one grid step == one encoder layer (embedding fused into step 0,
# output heads fused into the last step).                                       #
# --------------------------------------------------------------------------- #

def _tree_sum(xs):
    while len(xs) > 1:
        nxt = [xs[i] + xs[i + 1] for i in range(0, len(xs) - 1, 2)]
        if len(xs) % 2:
            nxt.append(xs[-1])
        xs = nxt
    return xs[0]


def _model2_kernel(x_ref, emb_w_ref, emb_b_ref, head_w_ref, head_b_ref,
                   wqkv_ref, bqkv_ref, wout_ref, vec_ref,
                   ff1_w_ref, ff1_b_ref, ff2_wt_ref,
                   out_ref, h_ref, *, n_head, n_batch, eps):
    layer = pl.program_id(0)
    n_layers = pl.num_programs(0)
    SB, D = h_ref.shape
    dh = D // n_head

    def mm(a, w):
        # (M,K)@(K,N).  Weights are pre-transposed host-side (bf16); activations are
        # cast to the weight dtype so the MXU runs native bf16 with f32 accumulation.
        return jax.lax.dot_general(a.astype(w.dtype), w, (((1,), (0,)), ((), ())),
                                   preferred_element_type=jnp.float32)

    def mm_t(a, w):
        # (M,K) x (N,K) contracting the LAST dim of both -> (M,N).  Lets the second
        # FFN weight live as a lane-dense (D, d_ff) slab in HBM/VMEM.
        return jax.lax.dot_general(a.astype(w.dtype), w, (((1,), (1,)), ((), ())),
                                   preferred_element_type=jnp.float32)

    def layer_norm(y, g, b):
        mu = jnp.mean(y, axis=-1, keepdims=True)
        var = jnp.mean((y - mu) ** 2, axis=-1, keepdims=True)
        return (y - mu) * jax.lax.rsqrt(var + eps) * g + b

    # Same-batch additive mask, built in-kernel (no extra input DMA).  Rows of the
    # flattened (S*B, .) slab are ordered (s, b) -> row i belongs to batch i % B.
    # f32 iota + floor avoids integer div/rem on the VPU.
    ri = jax.lax.broadcasted_iota(jnp.int32, (SB, SB), 0).astype(jnp.float32)
    ci = jax.lax.broadcasted_iota(jnp.int32, (SB, SB), 1).astype(jnp.float32)
    frac = (ri - ci) * (1.0 / n_batch)
    mask = jnp.where(frac == jnp.floor(frac), 0.0, -1e30)

    # ---- embedding (first grid step only; h lives in VMEM scratch afterwards) ----
    @pl.when(layer == 0)
    def _():
        h_ref[...] = mm(x_ref[...], emb_w_ref[...]) + emb_b_ref[...]

    h = h_ref[...]                                               # (SB, D) f32

    # ---- self attention: head-major weights -> no lane sub-slices -----------------
    scores, vhs = [], []
    for hd in range(n_head):
        q_h = mm(h, wqkv_ref[0 * n_head + hd]) + bqkv_ref[0 * n_head + hd]
        k_h = mm(h, wqkv_ref[1 * n_head + hd]) + bqkv_ref[1 * n_head + hd]
        v_h = mm(h, wqkv_ref[2 * n_head + hd]) + bqkv_ref[2 * n_head + hd]
        # 1/sqrt(dh) is folded into the q weights/bias on the host.
        scores.append(mm_t(q_h, k_h) + mask)                     # (SB, SB)
        vhs.append(v_h)

    # one batched softmax for all heads: (n_head*SB, SB); 16-row concat offsets are
    # sublane aligned; EUP reciprocal keeps the divide off the VPU critical path.
    s_all = jnp.concatenate(scores, axis=0)
    m = jnp.max(s_all, axis=-1, keepdims=True)
    e = jnp.exp(s_all - m)
    p_all = e * pl.reciprocal(jnp.sum(e, axis=-1, keepdims=True), approx=True)

    outs = []
    for hd in range(n_head):
        p_h = p_all[hd * SB:(hd + 1) * SB, :]                    # sublane-aligned slice
        oh = mm(p_h, vhs[hd])                                    # (SB, dh)
        outs.append(mm(oh, wout_ref[hd]))                        # (SB, D)
    attn = _tree_sum(outs) + vec_ref[0]                          # + out_proj bias

    h = layer_norm(h + attn, vec_ref[1], vec_ref[2])             # post-norm (PyTorch)

    # ---- feed-forward (ReLU, d_ff = 2048) ------------------------------------------
    ff = jnp.maximum(mm(h, ff1_w_ref[...]) + ff1_b_ref[...], 0.0)
    ff = mm_t(ff, ff2_wt_ref[...]) + vec_ref[3]
    h = layer_norm(h + ff, vec_ref[4], vec_ref[5])
    h_ref[...] = h

    # ---- output heads (last grid step): one lane-contiguous (SB, 1+n_comb) write ---
    @pl.when(layer == n_layers - 1)
    def _():
        y = mm(h, head_w_ref[...]) + head_b_ref[...]             # (SB, 1 + n_comb)
        col = jax.lax.broadcasted_iota(jnp.int32, y.shape, 1)
        is_comb = col >= 1
        yc = jnp.where(is_comb, y, -jnp.inf)                     # softmax over cols 1..
        mc = jnp.max(yc, axis=-1, keepdims=True)
        ec = jnp.exp(yc - mc)
        comb = ec / jnp.sum(ec, axis=-1, keepdims=True)          # exact (user-facing)
        out_ref[...] = jnp.where(is_comb, comb, jax.nn.sigmoid(y))


# --------------------------------------------------------------------------- #
# wrapper                                                                      #
# --------------------------------------------------------------------------- #

def model2_forward(x, kp):
    """x: (S, B, 93) -> (y_stroke (S,B,1), y_comb (S,B,n_comb))."""
    S, B, F = x.shape
    SB = S * B
    num_layers = kp["wqkv"].shape[0]
    n_head = kp["wout"].shape[1]
    D = kp["emb_w"].shape[1]
    FPAD = kp["emb_w"].shape[0]
    NOUT = kp["head_w"].shape[1]
    d_ff = kp["ff1_w"].shape[2]
    dh = D // n_head

    x2 = jnp.pad(x.reshape(SB, F), ((0, 0), (0, FPAD - F)))      # aligned contraction

    out = pl.pallas_call(
        functools.partial(_model2_kernel, n_head=n_head, n_batch=B, eps=1e-5),
        grid=(num_layers,),
        out_shape=jax.ShapeDtypeStruct((SB, NOUT), jnp.float32),
        in_specs=[
            # layer-invariant blocks (constant index -> DMA'd once, kept resident)
            pl.BlockSpec((SB, FPAD), lambda l: (0, 0)),
            pl.BlockSpec((FPAD, D), lambda l: (0, 0)),
            pl.BlockSpec((1, D), lambda l: (0, 0)),
            pl.BlockSpec((D, NOUT), lambda l: (0, 0)),
            pl.BlockSpec((1, NOUT), lambda l: (0, 0)),
            # per-layer weight blocks (double-buffered behind the previous layer)
            pl.BlockSpec((None, 3 * n_head, D, dh), lambda l: (l, 0, 0, 0)),
            pl.BlockSpec((None, 3 * n_head, 1, dh), lambda l: (l, 0, 0, 0)),
            pl.BlockSpec((None, n_head, dh, D), lambda l: (l, 0, 0, 0)),
            pl.BlockSpec((None, 6, 1, D), lambda l: (l, 0, 0, 0)),
            pl.BlockSpec((None, D, d_ff), lambda l: (l, 0, 0)),
            pl.BlockSpec((None, 1, d_ff), lambda l: (l, 0, 0)),
            pl.BlockSpec((None, D, d_ff), lambda l: (l, 0, 0)),
        ],
        out_specs=pl.BlockSpec((SB, NOUT), lambda l: (0, 0)),
        scratch_shapes=[pltpu.VMEM((SB, D), jnp.float32)],        # h carried over layers
        compiler_params=pltpu.CompilerParams(
            dimension_semantics=("arbitrary",)),
    )(x2, kp["emb_w"], kp["emb_b"], kp["head_w"], kp["head_b"],
      kp["wqkv"], kp["bqkv"], kp["wout"], kp["vec"],
      kp["ff1_w"], kp["ff1_b"], kp["ff2_wt"])

    y_stroke = out[:, :1].reshape(S, B, 1)
    y_comb = out[:, 1:].reshape(S, B, NOUT - 1)
    return y_stroke, y_comb


# --------------------------------------------------------------------------- #
# parameters: PyTorch-layout init + one-time packing into the kernel layout    #
# --------------------------------------------------------------------------- #

def init_torch_params(key, d_model, num_layers, d_ff=2048, n_comb=20, in_features=93):
    """Random parameters laid out exactly like the PyTorch module holds them."""
    scale = 0.05

    def nrm(k, shape):
        return scale * jax.random.normal(k, shape, dtype=jnp.float32)

    keys = iter(jax.random.split(key, 8 + 8 * num_layers))
    p = {
        "emb_w": nrm(next(keys), (d_model, in_features)),
        "emb_b": nrm(next(keys), (d_model,)),
        "stroke_w": nrm(next(keys), (1, d_model)),
        "stroke_b": jnp.zeros((1,), jnp.float32),
        "comb_w": nrm(next(keys), (n_comb, d_model)),
        "comb_b": jnp.zeros((n_comb,), jnp.float32),
        "layers": [],
    }
    for _ in range(num_layers):
        p["layers"].append({
            "in_proj_w": nrm(next(keys), (3 * d_model, d_model)),
            "in_proj_b": nrm(next(keys), (3 * d_model,)),
            "out_proj_w": nrm(next(keys), (d_model, d_model)),
            "out_proj_b": jnp.zeros((d_model,), jnp.float32),
            "ln1_g": jnp.ones((d_model,), jnp.float32),
            "ln1_b": jnp.zeros((d_model,), jnp.float32),
            "ff1_w": nrm(next(keys), (d_ff, d_model)),
            "ff1_b": jnp.zeros((d_ff,), jnp.float32),
            "ff2_w": nrm(next(keys), (d_model, d_ff)),
            "ff2_b": jnp.zeros((d_model,), jnp.float32),
            "ln2_g": jnp.ones((d_model,), jnp.float32),
            "ln2_b": jnp.zeros((d_model,), jnp.float32),
        })
    return p


def pack_params(tp, n_head, f_pad=128, weight_dtype=jnp.bfloat16):
    """One-time host-side packing: transpose to (in, out), head-major QKV/out-proj,
    fold 1/sqrt(dh) into q, zero-pad in_features, stack per-layer, cast matmul
    weights to bf16 (biases / LayerNorm params stay f32)."""
    D = tp["emb_w"].shape[0]
    in_features = tp["emb_w"].shape[1]
    dh = D // n_head
    q_scale = 1.0 / math.sqrt(dh)

    emb_w = jnp.zeros((f_pad, D), jnp.float32).at[:in_features].set(tp["emb_w"].T)
    head_w = jnp.concatenate([tp["stroke_w"], tp["comb_w"]], axis=0).T   # (D, 1+n_comb)
    head_b = jnp.concatenate([tp["stroke_b"], tp["comb_b"]])[None, :]

    def head_major_w(w, s=1.0):
        # PyTorch (D_out, D_in) -> (n_head, D_in, dh): q/k/v columns of head h come
        # straight out of a (SB, D) @ (D, dh) matmul, no lane slicing in the kernel.
        return (s * w).reshape(n_head, dh, D).transpose(0, 2, 1)

    wqkv, bqkv, wout, vec, ff1_w, ff1_b, ff2_wt = [], [], [], [], [], [], []
    for lyr in tp["layers"]:
        wq, wk, wv = jnp.split(lyr["in_proj_w"], 3, axis=0)
        bq, bk, bv = jnp.split(lyr["in_proj_b"], 3, axis=0)
        wqkv.append(jnp.concatenate(
            [head_major_w(wq, q_scale), head_major_w(wk), head_major_w(wv)], axis=0))
        bqkv.append(jnp.concatenate(
            [(q_scale * bq).reshape(n_head, 1, dh),
             bk.reshape(n_head, 1, dh),
             bv.reshape(n_head, 1, dh)], axis=0))
        wout.append(lyr["out_proj_w"].T.reshape(n_head, dh, D))
        vec.append(jnp.stack([lyr["out_proj_b"], lyr["ln1_g"], lyr["ln1_b"],
                              lyr["ff2_b"], lyr["ln2_g"], lyr["ln2_b"]])[:, None, :])
        ff1_w.append(lyr["ff1_w"].T)          # (D, d_ff)
        ff1_b.append(lyr["ff1_b"][None, :])   # (1, d_ff)
        ff2_wt.append(lyr["ff2_w"])           # (D, d_ff), contracted on last dim

    wd = weight_dtype
    return {
        "emb_w": emb_w.astype(wd), "emb_b": tp["emb_b"][None, :],
        "head_w": head_w.astype(wd), "head_b": head_b,
        "wqkv": jnp.stack(wqkv).astype(wd),
        "bqkv": jnp.stack(bqkv),
        "wout": jnp.stack(wout).astype(wd),
        "vec": jnp.stack(vec),
        "ff1_w": jnp.stack(ff1_w).astype(wd),
        "ff1_b": jnp.stack(ff1_b),
        "ff2_wt": jnp.stack(ff2_wt).astype(wd),
    }


# --------------------------------------------------------------------------- #
# pure-JAX f32 reference (straight port of Model_2.forward, inference mode)    #
# --------------------------------------------------------------------------- #

def _ln_ref(y, g, b, eps=1e-5):
    mu = y.mean(-1, keepdims=True)
    var = ((y - mu) ** 2).mean(-1, keepdims=True)
    return (y - mu) / jnp.sqrt(var + eps) * g + b


def model2_reference(x, tp, n_head):
    S, B, _ = x.shape
    D = tp["emb_w"].shape[0]
    dh = D // n_head
    h = x @ tp["emb_w"].T + tp["emb_b"]
    for lyr in tp["layers"]:
        qkv = h @ lyr["in_proj_w"].T + lyr["in_proj_b"]
        q, k, v = jnp.split(qkv, 3, axis=-1)

        def split_heads(t):                       # (S,B,D) -> (B,H,S,dh)
            return t.reshape(S, B, n_head, dh).transpose(1, 2, 0, 3)

        qh, kh, vh = split_heads(q), split_heads(k), split_heads(v)
        s = jnp.einsum("bhqd,bhkd->bhqk", qh, kh) / math.sqrt(dh)
        p = jax.nn.softmax(s, axis=-1)
        o = jnp.einsum("bhqk,bhkd->bhqd", p, vh).transpose(2, 0, 1, 3).reshape(S, B, D)
        attn = o @ lyr["out_proj_w"].T + lyr["out_proj_b"]
        h = _ln_ref(h + attn, lyr["ln1_g"], lyr["ln1_b"])
        ff = jax.nn.relu(h @ lyr["ff1_w"].T + lyr["ff1_b"])
        ff = ff @ lyr["ff2_w"].T + lyr["ff2_b"]
        h = _ln_ref(h + ff, lyr["ln2_g"], lyr["ln2_b"])
    y_stroke = jax.nn.sigmoid(h @ tp["stroke_w"].T + tp["stroke_b"])
    y_comb = jax.nn.softmax(h @ tp["comb_w"].T + tp["comb_b"], axis=-1)
    return y_stroke, y_comb


# --------------------------------------------------------------------------- #

if __name__ == "__main__":
    # Small config: sequence_len=8, batch=2, d_model=32, n_head=4, num_layers=2,
    # void_let_serve=True (comb head = 20 classes), return_as_one=False.
    S, B, F = 8, 2, 93
    d_model, n_head, num_layers = 32, 4, 2

    key = jax.random.PRNGKey(0)
    k_x, k_p = jax.random.split(key)
    x = jax.random.normal(k_x, (S, B, F), dtype=jnp.float32)

    tp = init_torch_params(k_p, d_model, num_layers)
    kp = pack_params(tp, n_head)

    fwd = jax.jit(model2_forward)
    y_stroke, y_comb = fwd(x, kp)
    jax.block_until_ready((y_stroke, y_comb))

    assert y_stroke.shape == (S, B, 1)
    assert y_comb.shape == (S, B, 20)
    # softmax rows sum to 1, sigmoid strictly inside (0, 1)
    assert bool(jnp.all(jnp.abs(jnp.sum(y_comb, axis=-1) - 1.0) < 1e-3))
    assert bool(jnp.all((y_stroke > 0.0) & (y_stroke < 1.0)))

    # compare against the f32 pure-JAX reference (kernel uses bf16 weights + approx
    # reciprocal in the attention softmax -> loose tolerance on the probabilities)
    r_stroke, r_comb = model2_reference(x, tp, n_head)
    assert float(jnp.max(jnp.abs(y_stroke - r_stroke))) < 3e-2
    assert float(jnp.max(jnp.abs(y_comb - r_comb))) < 3e-2

    # TODO(synk): return_as_one=True path (adapt_output_2: threshold/argmax + python
    # dict lookup to rebuild label vectors) is host-side post-processing, not a kernel.
    print("KERNEL_OK")
</pallas_src>

<mosaic_0001>
module attributes {stable_mosaic.version = 11 : i64} {
  func.func @_model2_kernel(%arg0: i32, %arg1: memref<16x128xf32, #tpu.memory_space<vmem>>, %arg2: memref<128x32xbf16, #tpu.memory_space<vmem>>, %arg3: memref<1x32xf32, #tpu.memory_space<vmem>>, %arg4: memref<32x21xbf16, #tpu.memory_space<vmem>>, %arg5: memref<1x21xf32, #tpu.memory_space<vmem>>, %arg6: memref<1x12x32x8xbf16, #tpu.memory_space<vmem>>, %arg7: memref<1x12x1x8xf32, #tpu.memory_space<vmem>>, %arg8: memref<1x4x8x32xbf16, #tpu.memory_space<vmem>>, %arg9: memref<1x6x1x32xf32, #tpu.memory_space<vmem>>, %arg10: memref<1x32x2048xbf16, #tpu.memory_space<vmem>>, %arg11: memref<1x1x2048xf32, #tpu.memory_space<vmem>>, %arg12: memref<1x32x2048xbf16, #tpu.memory_space<vmem>>, %arg13: memref<16x21xf32, #tpu.memory_space<vmem>>, %arg14: memref<16x32xf32, #tpu.memory_space<vmem>>) attributes {dimension_semantics = [#tpu.dimension_semantics<arbitrary>], iteration_bounds = array<i64: 2>, scalar_prefetch = 0 : i64, scratch_operands = 1 : i64, tpu.core_type = #tpu.core_type<tc>, window_params = [{pipeline_mode = #tpu.pipeline_mode<synchronous>, transform_indices = @transform_0, window_bounds = array<i64: 16, 128>}, {pipeline_mode = #tpu.pipeline_mode<synchronous>, transform_indices = @transform_1, window_bounds = array<i64: 128, 32>}, {pipeline_mode = #tpu.pipeline_mode<synchronous>, transform_indices = @transform_2, window_bounds = array<i64: 1, 32>}, {pipeline_mode = #tpu.pipeline_mode<synchronous>, transform_indices = @transform_3, window_bounds = array<i64: 32, 21>}, {pipeline_mode = #tpu.pipeline_mode<synchronous>, transform_indices = @transform_4, window_bounds = array<i64: 1, 21>}, {transform_indices = @transform_5, window_bounds = array<i64: 1, 12, 32, 8>}, {transform_indices = @transform_6, window_bounds = array<i64: 1, 12, 1, 8>}, {transform_indices = @transform_7, window_bounds = array<i64: 1, 4, 8, 32>}, {transform_indices = @transform_8, window_bounds = array<i64: 1, 6, 1, 32>}, {transform_indices = @transform_9, window_bounds = array<i64: 1, 32, 2048>}, {transform_indices = @transform_10, window_bounds = array<i64: 1, 1, 2048>}, {transform_indices = @transform_11, window_bounds = array<i64: 1, 32, 2048>}, {pipeline_mode = #tpu.pipeline_mode<synchronous>, transform_indices = @transform_12, window_bounds = array<i64: 16, 21>}]} {
    %0 = tpu.iota {dimensions = array<i32: 0>} : vector<16x16xi32>
    %1 = arith.sitofp %0 : vector<16x16xi32> to vector<16x16xf32>
    %2 = tpu.iota {dimensions = array<i32: 1>} : vector<16x16xi32>
    %3 = arith.sitofp %2 : vector<16x16xi32> to vector<16x16xf32>
    %4 = arith.subf %1, %3 : vector<16x16xf32>
    %cst = arith.constant 5.000000e-01 : f32
    %5 = vector.broadcast %cst : f32 to vector<16x16xf32>
    %6 = arith.mulf %4, %5 : vector<16x16xf32>
    %7 = math.floor %6 : vector<16x16xf32>
    %8 = arith.cmpf oeq, %6, %7 : vector<16x16xf32>
    %cst_0 = arith.constant 0.000000e+00 : f32
    %cst_1 = arith.constant -1.000000e+30 : f32
    %9 = vector.broadcast %cst_0 : f32 to vector<16x16xf32>
    %10 = vector.broadcast %cst_1 : f32 to vector<16x16xf32>
    %11 = arith.select %8, %9, %10 : vector<16x16xi1>, vector<16x16xf32>
    %c0_i32 = arith.constant 0 : i32
    %12 = arith.cmpi eq, %arg0, %c0_i32 : i32
    %13 = arith.extui %12 : i1 to i32
    %c0_i32_2 = arith.constant 0 : i32
    %14 = arith.cmpi ne, %13, %c0_i32_2 : i32
    scf.if %14 {
      %c0_180 = arith.constant 0 : index
      %c0_181 = arith.constant 0 : index
      %238 = vector.load %arg1[%c0_180, %c0_181] : memref<16x128xf32, #tpu.memory_space<vmem>>, vector<16x128xf32>
      %c0_182 = arith.constant 0 : index
      %c0_183 = arith.constant 0 : index
      %239 = vector.load %arg2[%c0_182, %c0_183] : memref<128x32xbf16, #tpu.memory_space<vmem>>, vector<128x32xbf16>
      %240 = arith.truncf %238 : vector<16x128xf32> to vector<16x128xbf16>
      %cst_184 = arith.constant dense<0.000000e+00> : vector<16x32xf32>
      %241 = tpu.matmul %240, %239, %cst_184 {dimension_numbers = #tpu.dot_dimension_numbers<[1], [0], [0], [1], [0, 0, 1, 1], [], []>} : vector<16x128xbf16>, vector<128x32xbf16>, vector<16x32xf32> -> vector<16x32xf32>
      %c0_185 = arith.constant 0 : index
      %c0_186 = arith.constant 0 : index
      %242 = vector.load %arg3[%c0_185, %c0_186] : memref<1x32xf32, #tpu.memory_space<vmem>>, vector<1x32xf32>
      %243 = vector.broadcast %242 : vector<1x32xf32> to vector<16x32xf32>
      %244 = arith.addf %241, %243 : vector<16x32xf32>
      %c0_187 = arith.constant 0 : index
      %c0_188 = arith.constant 0 : index
      %245 = vector.load %arg14[%c0_187, %c0_188] : memref<16x32xf32, #tpu.memory_space<vmem>>, vector<16x32xf32>
      tpu.vector_store %arg14[%c0_187, %c0_188], %244 {strides = array<i32>} : memref<16x32xf32, #tpu.memory_space<vmem>>, vector<16x32xf32>,
    } else {
    }
    %c0 = arith.constant 0 : index
    %c0_3 = arith.constant 0 : index
    %15 = vector.load %arg14[%c0, %c0_3] : memref<16x32xf32, #tpu.memory_space<vmem>>, vector<16x32xf32>
    %c0_4 = arith.constant 0 : index
    %c0_5 = arith.constant 0 : index
    %c0_6 = arith.constant 0 : index
    %c0_7 = arith.constant 0 : index
    %16 = vector.load %arg6[%c0_4, %c0_5, %c0_6, %c0_7] : memref<1x12x32x8xbf16, #tpu.memory_space<vmem>>, vector<1x1x32x8xbf16>
    %17 = vector.shape_cast %16 : vector<1x1x32x8xbf16> to vector<32x8xbf16>
    %18 = arith.truncf %15 : vector<16x32xf32> to vector<16x32xbf16>
    %cst_8 = arith.constant dense<0.000000e+00> : vector<16x8xf32>
    %19 = tpu.matmul %18, %17, %cst_8 {dimension_numbers = #tpu.dot_dimension_numbers<[1], [0], [0], [1], [0, 0, 1, 1], [], []>} : vector<16x32xbf16>, vector<32x8xbf16>, vector<16x8xf32> -> vector<16x8xf32>
    %c0_9 = arith.constant 0 : index
    %c0_10 = arith.constant 0 : index
    %c0_11 = arith.constant 0 : index
    %c0_12 = arith.constant 0 : index
    %20 = vector.load %arg7[%c0_9, %c0_10, %c0_11, %c0_12] : memref<1x12x1x8xf32, #tpu.memory_space<vmem>>, vector<1x1x1x8xf32>
    %21 = vector.shape_cast %20 : vector<1x1x1x8xf32> to vector<1x8xf32>
    %22 = vector.broadcast %21 : vector<1x8xf32> to vector<16x8xf32>
    %23 = arith.addf %19, %22 : vector<16x8xf32>
    %c0_13 = arith.constant 0 : index
    %c4 = arith.constant 4 : index
    %c0_14 = arith.constant 0 : index
    %c0_15 = arith.constant 0 : index
    %24 = vector.load %arg6[%c0_13, %c4, %c0_14, %c0_15] : memref<1x12x32x8xbf16, #tpu.memory_space<vmem>>, vector<1x1x32x8xbf16>
    %25 = vector.shape_cast %24 : vector<1x1x32x8xbf16> to vector<32x8xbf16>
    %26 = arith.truncf %15 : vector<16x32xf32> to vector<16x32xbf16>
    %cst_16 = arith.constant dense<0.000000e+00> : vector<16x8xf32>
    %27 = tpu.matmul %26, %25, %cst_16 {dimension_numbers = #tpu.dot_dimension_numbers<[1], [0], [0], [1], [0, 0, 1, 1], [], []>} : vector<16x32xbf16>, vector<32x8xbf16>, vector<16x8xf32> -> vector<16x8xf32>
    %c0_17 = arith.constant 0 : index
    %c4_18 = arith.constant 4 : index
    %c0_19 = arith.constant 0 : index
    %c0_20 = arith.constant 0 : index
    %28 = vector.load %arg7[%c0_17, %c4_18, %c0_19, %c0_20] : memref<1x12x1x8xf32, #tpu.memory_space<vmem>>, vector<1x1x1x8xf32>
    %29 = vector.shape_cast %28 : vector<1x1x1x8xf32> to vector<1x8xf32>
    %30 = vector.broadcast %29 : vector<1x8xf32> to vector<16x8xf32>
    %31 = arith.addf %27, %30 : vector<16x8xf32>
    %c0_21 = arith.constant 0 : index
    %c8 = arith.constant 8 : index
    %c0_22 = arith.constant 0 : index
    %c0_23 = arith.constant 0 : index
    %32 = vector.load %arg6[%c0_21, %c8, %c0_22, %c0_23] : memref<1x12x32x8xbf16, #tpu.memory_space<vmem>>, vector<1x1x32x8xbf16>
    %33 = vector.shape_cast %32 : vector<1x1x32x8xbf16> to vector<32x8xbf16>
    %34 = arith.truncf %15 : vector<16x32xf32> to vector<16x32xbf16>
    %cst_24 = arith.constant dense<0.000000e+00> : vector<16x8xf32>
    %35 = tpu.matmul %34, %33, %cst_24 {dimension_numbers = #tpu.dot_dimension_numbers<[1], [0], [0], [1], [0, 0, 1, 1], [], []>} : vector<16x32xbf16>, vector<32x8xbf16>, vector<16x8xf32> -> vector<16x8xf32>
    %c0_25 = arith.constant 0 : index
    %c8_26 = arith.constant 8 : index
    %c0_27 = arith.constant 0 : index
    %c0_28 = arith.constant 0 : index
    %36 = vector.load %arg7[%c0_25, %c8_26, %c0_27, %c0_28] : memref<1x12x1x8xf32, #tpu.memory_space<vmem>>, vector<1x1x1x8xf32>
    %37 = vector.shape_cast %36 : vector<1x1x1x8xf32> to vector<1x8xf32>
    %38 = vector.broadcast %37 : vector<1x8xf32> to vector<16x8xf32>
    %39 = arith.addf %35, %38 : vector<16x8xf32>
    %cst_29 = arith.constant dense<0.000000e+00> : vector<16x16xf32>
    %40 = tpu.matmul %23, %31, %cst_29 {dimension_numbers = #tpu.dot_dimension_numbers<[1], [1], [0], [0], [0, 0, 1, 0], [], []>} : vector<16x8xf32>, vector<16x8xf32>, vector<16x16xf32> -> vector<16x16xf32>
    %41 = arith.addf %40, %11 : vector<16x16xf32>
    %c0_30 = arith.constant 0 : index
    %c1 = arith.constant 1 : index
    %c0_31 = arith.constant 0 : index
    %c0_32 = arith.constant 0 : index
    %42 = vector.load %arg6[%c0_30, %c1, %c0_31, %c0_32] : memref<1x12x32x8xbf16, #tpu.memory_space<vmem>>, vector<1x1x32x8xbf16>
    %43 = vector.shape_cast %42 : vector<1x1x32x8xbf16> to vector<32x8xbf16>
    %44 = arith.truncf %15 : vector<16x32xf32> to vector<16x32xbf16>
    %cst_33 = arith.constant dense<0.000000e+00> : vector<16x8xf32>
    %45 = tpu.matmul %44, %43, %cst_33 {dimension_numbers = #tpu.dot_dimension_numbers<[1], [0], [0], [1], [0, 0, 1, 1], [], []>} : vector<16x32xbf16>, vector<32x8xbf16>, vector<16x8xf32> -> vector<16x8xf32>
    %c0_34 = arith.constant 0 : index
    %c1_35 = arith.constant 1 : index
    %c0_36 = arith.constant 0 : index
    %c0_37 = arith.constant 0 : index
    %46 = vector.load %arg7[%c0_34, %c1_35, %c0_36, %c0_37] : memref<1x12x1x8xf32, #tpu.memory_space<vmem>>, vector<1x1x1x8xf32>
    %47 = vector.shape_cast %46 : vector<1x1x1x8xf32> to vector<1x8xf32>
    %48 = vector.broadcast %47 : vector<1x8xf32> to vector<16x8xf32>
    %49 = arith.addf %45, %48 : vector<16x8xf32>
    %c0_38 = arith.constant 0 : index
    %c5 = arith.constant 5 : index
    %c0_39 = arith.constant 0 : index
    %c0_40 = arith.constant 0 : index
    %50 = vector.load %arg6[%c0_38, %c5, %c0_39, %c0_40] : memref<1x12x32x8xbf16, #tpu.memory_space<vmem>>, vector<1x1x32x8xbf16>
    %51 = vector.shape_cast %50 : vector<1x1x32x8xbf16> to vector<32x8xbf16>
    %52 = arith.truncf %15 : vector<16x32xf32> to vector<16x32xbf16>
    %cst_41 = arith.constant dense<0.000000e+00> : vector<16x8xf32>
    %53 = tpu.matmul %52, %51, %cst_41 {dimension_numbers = #tpu.dot_dimension_numbers<[1], [0], [0], [1], [0, 0, 1, 1], [], []>} : vector<16x32xbf16>, vector<32x8xbf16>, vector<16x8xf32> -> vector<16x8xf32>
    %c0_42 = arith.constant 0 : index
    %c5_43 = arith.constant 5 : index
    %c0_44 = arith.constant 0 : index
    %c0_45 = arith.constant 0 : index
    %54 = vector.load %arg7[%c0_42, %c5_43, %c0_44, %c0_45] : memref<1x12x1x8xf32, #tpu.memory_space<vmem>>, vector<1x1x1x8xf32>
    %55 = vector.shape_cast %54 : vector<1x1x1x8xf32> to vector<1x8xf32>
    %56 = vector.broadcast %55 : vector<1x8xf32> to vector<16x8xf32>
    %57 = arith.addf %53, %56 : vector<16x8xf32>
    %c0_46 = arith.constant 0 : index
    %c9 = arith.constant 9 : index
    %c0_47 = arith.constant 0 : index
    %c0_48 = arith.constant 0 : index
    %58 = vector.load %arg6[%c0_46, %c9, %c0_47, %c0_48] : memref<1x12x32x8xbf16, #tpu.memory_space<vmem>>, vector<1x1x32x8xbf16>
    %59 = vector.shape_cast %58 : vector<1x1x32x8xbf16> to vector<32x8xbf16>
    %60 = arith.truncf %15 : vector<16x32xf32> to vector<16x32xbf16>
    %cst_49 = arith.constant dense<0.000000e+00> : vector<16x8xf32>
    %61 = tpu.matmul %60, %59, %cst_49 {dimension_numbers = #tpu.dot_dimension_numbers<[1], [0], [0], [1], [0, 0, 1, 1], [], []>} : vector<16x32xbf16>, vector<32x8xbf16>, vector<16x8xf32> -> vector<16x8xf32>
    %c0_50 = arith.constant 0 : index
    %c9_51 = arith.constant 9 : index
    %c0_52 = arith.constant 0 : index
    %c0_53 = arith.constant 0 : index
    %62 = vector.load %arg7[%c0_50, %c9_51, %c0_52, %c0_53] : memref<1x12x1x8xf32, #tpu.memory_space<vmem>>, vector<1x1x1x8xf32>
    %63 = vector.shape_cast %62 : vector<1x1x1x8xf32> to vector<1x8xf32>
    %64 = vector.broadcast %63 : vector<1x8xf32> to vector<16x8xf32>
    %65 = arith.addf %61, %64 : vector<16x8xf32>
    %cst_54 = arith.constant dense<0.000000e+00> : vector<16x16xf32>
    %66 = tpu.matmul %49, %57, %cst_54 {dimension_numbers = #tpu.dot_dimension_numbers<[1], [1], [0], [0], [0, 0, 1, 0], [], []>} : vector<16x8xf32>, vector<16x8xf32>, vector<16x16xf32> -> vector<16x16xf32>
    %67 = arith.addf %66, %11 : vector<16x16xf32>
    %c0_55 = arith.constant 0 : index
    %c2 = arith.constant 2 : index
    %c0_56 = arith.constant 0 : index
    %c0_57 = arith.constant 0 : index
    %68 = vector.load %arg6[%c0_55, %c2, %c0_56, %c0_57] : memref<1x12x32x8xbf16, #tpu.memory_space<vmem>>, vector<1x1x32x8xbf16>
    %69 = vector.shape_cast %68 : vector<1x1x32x8xbf16> to vector<32x8xbf16>
    %70 = arith.truncf %15 : vector<16x32xf32> to vector<16x32xbf16>
    %cst_58 = arith.constant dense<0.000000e+00> : vector<16x8xf32>
    %71 = tpu.matmul %70, %69, %cst_58 {dimension_numbers = #tpu.dot_dimension_numbers<[1], [0], [0], [1], [0, 0, 1, 1], [], []>} : vector<16x32xbf16>, vector<32x8xbf16>, vector<16x8xf32> -> vector<16x8xf32>
    %c0_59 = arith.constant 0 : index
    %c2_60 = arith.constant 2 : index
    %c0_61 = arith.constant 0 : index
    %c0_62 = arith.constant 0 : index
    %72 = vector.load %arg7[%c0_59, %c2_60, %c0_61, %c0_62] : memref<1x12x1x8xf32, #tpu.memory_space<vmem>>, vector<1x1x1x8xf32>
    %73 = vector.shape_cast %72 : vector<1x1x1x8xf32> to vector<1x8xf32>
    %74 = vector.broadcast %73 : vector<1x8xf32> to vector<16x8xf32>
    %75 = arith.addf %71, %74 : vector<16x8xf32>
    %c0_63 = arith.constant 0 : index
    %c6 = arith.constant 6 : index
    %c0_64 = arith.constant 0 : index
    %c0_65 = arith.constant 0 : index
    %76 = vector.load %arg6[%c0_63, %c6, %c0_64, %c0_65] : memref<1x12x32x8xbf16, #tpu.memory_space<vmem>>, vector<1x1x32x8xbf16>
    %77 = vector.shape_cast %76 : vector<1x1x32x8xbf16> to vector<32x8xbf16>
    %78 = arith.truncf %15 : vector<16x32xf32> to vector<16x32xbf16>
    %cst_66 = arith.constant dense<0.000000e+00> : vector<16x8xf32>
    %79 = tpu.matmul %78, %77, %cst_66 {dimension_numbers = #tpu.dot_dimension_numbers<[1], [0], [0], [1], [0, 0, 1, 1], [], []>} : vector<16x32xbf16>, vector<32x8xbf16>, vector<16x8xf32> -> vector<16x8xf32>
    %c0_67 = arith.constant 0 : index
    %c6_68 = arith.constant 6 : index
    %c0_69 = arith.constant 0 : index
    %c0_70 = arith.constant 0 : index
    %80 = vector.load %arg7[%c0_67, %c6_68, %c0_69, %c0_70] : memref<1x12x1x8xf32, #tpu.memory_space<vmem>>, vector<1x1x1x8xf32>
    %81 = vector.shape_cast %80 : vector<1x1x1x8xf32> to vector<1x8xf32>
    %82 = vector.broadcast %81 : vector<1x8xf32> to vector<16x8xf32>
    %83 = arith.addf %79, %82 : vector<16x8xf32>
    %c0_71 = arith.constant 0 : index
    %c10 = arith.constant 10 : index
    %c0_72 = arith.constant 0 : index
    %c0_73 = arith.constant 0 : index
    %84 = vector.load %arg6[%c0_71, %c10, %c0_72, %c0_73] : memref<1x12x32x8xbf16, #tpu.memory_space<vmem>>, vector<1x1x32x8xbf16>
    %85 = vector.shape_cast %84 : vector<1x1x32x8xbf16> to vector<32x8xbf16>
    %86 = arith.truncf %15 : vector<16x32xf32> to vector<16x32xbf16>
    %cst_74 = arith.constant dense<0.000000e+00> : vector<16x8xf32>
    %87 = tpu.matmul %86, %85, %cst_74 {dimension_numbers = #tpu.dot_dimension_numbers<[1], [0], [0], [1], [0, 0, 1, 1], [], []>} : vector<16x32xbf16>, vector<32x8xbf16>, vector<16x8xf32> -> vector<16x8xf32>
    %c0_75 = arith.constant 0 : index
    %c10_76 = arith.constant 10 : index
    %c0_77 = arith.constant 0 : index
    %c0_78 = arith.constant 0 : index
    %88 = vector.load %arg7[%c0_75, %c10_76, %c0_77, %c0_78] : memref<1x12x1x8xf32, #tpu.memory_space<vmem>>, vector<1x1x1x8xf32>
    %89 = vector.shape_cast %88 : vector<1x1x1x8xf32> to vector<1x8xf32>
    %90 = vector.broadcast %89 : vector<1x8xf32> to vector<16x8xf32>
    %91 = arith.addf %87, %90 : vector<16x8xf32>
    %cst_79 = arith.constant dense<0.000000e+00> : vector<16x16xf32>
    %92 = tpu.matmul %75, %83, %cst_79 {dimension_numbers = #tpu.dot_dimension_numbers<[1], [1], [0], [0], [0, 0, 1, 0], [], []>} : vector<16x8xf32>, vector<16x8xf32>, vector<16x16xf32> -> vector<16x16xf32>
    %93 = arith.addf %92, %11 : vector<16x16xf32>
    %c0_80 = arith.constant 0 : index
    %c3 = arith.constant 3 : index
    %c0_81 = arith.constant 0 : index
    %c0_82 = arith.constant 0 : index
    %94 = vector.load %arg6[%c0_80, %c3, %c0_81, %c0_82] : memref<1x12x32x8xbf16, #tpu.memory_space<vmem>>, vector<1x1x32x8xbf16>
    %95 = vector.shape_cast %94 : vector<1x1x32x8xbf16> to vector<32x8xbf16>
    %96 = arith.truncf %15 : vector<16x32xf32> to vector<16x32xbf16>
    %cst_83 = arith.constant dense<0.000000e+00> : vector<16x8xf32>
    %97 = tpu.matmul %96, %95, %cst_83 {dimension_numbers = #tpu.dot_dimension_numbers<[1], [0], [0], [1], [0, 0, 1, 1], [], []>} : vector<16x32xbf16>, vector<32x8xbf16>, vector<16x8xf32> -> vector<16x8xf32>
    %c0_84 = arith.constant 0 : index
    %c3_85 = arith.constant 3 : index
    %c0_86 = arith.constant 0 : index
    %c0_87 = arith.constant 0 : index
    %98 = vector.load %arg7[%c0_84, %c3_85, %c0_86, %c0_87] : memref<1x12x1x8xf32, #tpu.memory_space<vmem>>, vector<1x1x1x8xf32>
    %99 = vector.shape_cast %98 : vector<1x1x1x8xf32> to vector<1x8xf32>
    %100 = vector.broadcast %99 : vector<1x8xf32> to vector<16x8xf32>
    %101 = arith.addf %97, %100 : vector<16x8xf32>
    %c0_88 = arith.constant 0 : index
    %c7 = arith.constant 7 : index
    %c0_89 = arith.constant 0 : index
    %c0_90 = arith.constant 0 : index
    %102 = vector.load %arg6[%c0_88, %c7, %c0_89, %c0_90] : memref<1x12x32x8xbf16, #tpu.memory_space<vmem>>, vector<1x1x32x8xbf16>
    %103 = vector.shape_cast %102 : vector<1x1x32x8xbf16> to vector<32x8xbf16>
    %104 = arith.truncf %15 : vector<16x32xf32> to vector<16x32xbf16>
    %cst_91 = arith.constant dense<0.000000e+00> : vector<16x8xf32>
    %105 = tpu.matmul %104, %103, %cst_91 {dimension_numbers = #tpu.dot_dimension_numbers<[1], [0], [0], [1], [0, 0, 1, 1], [], []>} : vector<16x32xbf16>, vector<32x8xbf16>, vector<16x8xf32> -> vector<16x8xf32>
    %c0_92 = arith.constant 0 : index
    %c7_93 = arith.constant 7 : index
    %c0_94 = arith.constant 0 : index
    %c0_95 = arith.constant 0 : index
    %106 = vector.load %arg7[%c0_92, %c7_93, %c0_94, %c0_95] : memref<1x12x1x8xf32, #tpu.memory_space<vmem>>, vector<1x1x1x8xf32>
    %107 = vector.shape_cast %106 : vector<1x1x1x8xf32> to vector<1x8xf32>
    %108 = vector.broadcast %107 : vector<1x8xf32> to vector<16x8xf32>
    %109 = arith.addf %105, %108 : vector<16x8xf32>
    %c0_96 = arith.constant 0 : index
    %c11 = arith.constant 11 : index
    %c0_97 = arith.constant 0 : index
    %c0_98 = arith.constant 0 : index
    %110 = vector.load %arg6[%c0_96, %c11, %c0_97, %c0_98] : memref<1x12x32x8xbf16, #tpu.memory_space<vmem>>, vector<1x1x32x8xbf16>
    %111 = vector.shape_cast %110 : vector<1x1x32x8xbf16> to vector<32x8xbf16>
    %112 = arith.truncf %15 : vector<16x32xf32> to vector<16x32xbf16>
    %cst_99 = arith.constant dense<0.000000e+00> : vector<16x8xf32>
    %113 = tpu.matmul %112, %111, %cst_99 {dimension_numbers = #tpu.dot_dimension_numbers<[1], [0], [0], [1], [0, 0, 1, 1], [], []>} : vector<16x32xbf16>, vector<32x8xbf16>, vector<16x8xf32> -> vector<16x8xf32>
    %c0_100 = arith.constant 0 : index
    %c11_101 = arith.constant 11 : index
    %c0_102 = arith.constant 0 : index
    %c0_103 = arith.constant 0 : index
    %114 = vector.load %arg7[%c0_100, %c11_101, %c0_102, %c0_103] : memref<1x12x1x8xf32, #tpu.memory_space<vmem>>, vector<1x1x1x8xf32>
    %115 = vector.shape_cast %114 : vector<1x1x1x8xf32> to vector<1x8xf32>
    %116 = vector.broadcast %115 : vector<1x8xf32> to vector<16x8xf32>
    %117 = arith.addf %113, %116 : vector<16x8xf32>
    %cst_104 = arith.constant dense<0.000000e+00> : vector<16x16xf32>
    %118 = tpu.matmul %101, %109, %cst_104 {dimension_numbers = #tpu.dot_dimension_numbers<[1], [1], [0], [0], [0, 0, 1, 0], [], []>} : vector<16x8xf32>, vector<16x8xf32>, vector<16x16xf32> -> vector<16x16xf32>
    %119 = arith.addf %118, %11 : vector<16x16xf32>
    %120 = tpu.concatenate %41, %67, %93, %119 in 0 : vector<16x16xf32>, vector<16x16xf32>, vector<16x16xf32>, vector<16x16xf32> -> vector<64x16xf32>
    %cst_105 = arith.constant dense<0xFF800000> : vector<64xf32>
    %121 = vector.multi_reduction <maximumf>, %120, %cst_105 [1] : vector<64x16xf32> to vector<64xf32>
    %122 = vector.shape_cast %121 : vector<64xf32> to vector<64x1xf32>
    %123 = vector.broadcast %122 : vector<64x1xf32> to vector<64x16xf32>
    %124 = arith.subf %120, %123 : vector<64x16xf32>
    %125 = math.exp %124 : vector<64x16xf32>
    %cst_106 = arith.constant dense<0.000000e+00> : vector<64xf32>
    %126 = vector.multi_reduction <add>, %125, %cst_106 [1] : vector<64x16xf32> to vector<64xf32>
    %127 = vector.shape_cast %126 : vector<64xf32> to vector<64x1xf32>
    %128 = tpu.reciprocal %127 {approx = true} : vector<64x1xf32> -> vector<64x1xf32>
    %129 = vector.broadcast %128 : vector<64x1xf32> to vector<64x16xf32>
    %130 = arith.mulf %125, %129 : vector<64x16xf32>
    %131 = vector.extract_strided_slice %130 {offsets = [0, 0], sizes = [16, 16], strides = [1, 1]} : vector<64x16xf32> to vector<16x16xf32>
    %cst_107 = arith.constant dense<0.000000e+00> : vector<16x8xf32>
    %132 = tpu.matmul %131, %39, %cst_107 {dimension_numbers = #tpu.dot_dimension_numbers<[1], [0], [0], [1], [0, 0, 1, 1], [], []>} : vector<16x16xf32>, vector<16x8xf32>, vector<16x8xf32> -> vector<16x8xf32>
    %c0_108 = arith.constant 0 : index
    %c0_109 = arith.constant 0 : index
    %c0_110 = arith.constant 0 : index
    %c0_111 = arith.constant 0 : index
    %133 = vector.load %arg8[%c0_108, %c0_109, %c0_110, %c0_111] : memref<1x4x8x32xbf16, #tpu.memory_space<vmem>>, vector<1x1x8x32xbf16>
    %134 = vector.shape_cast %133 : vector<1x1x8x32xbf16> to vector<8x32xbf16>
    %135 = arith.truncf %132 : vector<16x8xf32> to vector<16x8xbf16>
    %cst_112 = arith.constant dense<0.000000e+00> : vector<16x32xf32>
    %136 = tpu.matmul %135, %134, %cst_112 {dimension_numbers = #tpu.dot_dimension_numbers<[1], [0], [0], [1], [0, 0, 1, 1], [], []>} : vector<16x8xbf16>, vector<8x32xbf16>, vector<16x32xf32> -> vector<16x32xf32>
    %137 = vector.extract_strided_slice %130 {offsets = [16, 0], sizes = [16, 16], strides = [1, 1]} : vector<64x16xf32> to vector<16x16xf32>
    %cst_113 = arith.constant dense<0.000000e+00> : vector<16x8xf32>
    %138 = tpu.matmul %137, %65, %cst_113 {dimension_numbers = #tpu.dot_dimension_numbers<[1], [0], [0], [1], [0, 0, 1, 1], [], []>} : vector<16x16xf32>, vector<16x8xf32>, vector<16x8xf32> -> vector<16x8xf32>
    %c0_114 = arith.constant 0 : index
    %c1_115 = arith.constant 1 : index
    %c0_116 = arith.constant 0 : index
    %c0_117 = arith.constant 0 : index
    %139 = vector.load %arg8[%c0_114, %c1_115, %c0_116, %c0_117] : memref<1x4x8x32xbf16, #tpu.memory_space<vmem>>, vector<1x1x8x32xbf16>
    %140 = vector.shape_cast %139 : vector<1x1x8x32xbf16> to vector<8x32xbf16>
    %141 = arith.truncf %138 : vector<16x8xf32> to vector<16x8xbf16>
    %cst_118 = arith.constant dense<0.000000e+00> : vector<16x32xf32>
    %142 = tpu.matmul %141, %140, %cst_118 {dimension_numbers = #tpu.dot_dimension_numbers<[1], [0], [0], [1], [0, 0, 1, 1], [], []>} : vector<16x8xbf16>, vector<8x32xbf16>, vector<16x32xf32> -> vector<16x32xf32>
    %143 = vector.extract_strided_slice %130 {offsets = [32, 0], sizes = [16, 16], strides = [1, 1]} : vector<64x16xf32> to vector<16x16xf32>
    %cst_119 = arith.constant dense<0.000000e+00> : vector<16x8xf32>
    %144 = tpu.matmul %143, %91, %cst_119 {dimension_numbers = #tpu.dot_dimension_numbers<[1], [0], [0], [1], [0, 0, 1, 1], [], []>} : vector<16x16xf32>, vector<16x8xf32>, vector<16x8xf32> -> vector<16x8xf32>
    %c0_120 = arith.constant 0 : index
    %c2_121 = arith.constant 2 : index
    %c0_122 = arith.constant 0 : index
    %c0_123 = arith.constant 0 : index
    %145 = vector.load %arg8[%c0_120, %c2_121, %c0_122, %c0_123] : memref<1x4x8x32xbf16, #tpu.memory_space<vmem>>, vector<1x1x8x32xbf16>
    %146 = vector.shape_cast %145 : vector<1x1x8x32xbf16> to vector<8x32xbf16>
    %147 = arith.truncf %144 : vector<16x8xf32> to vector<16x8xbf16>
    %cst_124 = arith.constant dense<0.000000e+00> : vector<16x32xf32>
    %148 = tpu.matmul %147, %146, %cst_124 {dimension_numbers = #tpu.dot_dimension_numbers<[1], [0], [0], [1], [0, 0, 1, 1], [], []>} : vector<16x8xbf16>, vector<8x32xbf16>, vector<16x32xf32> -> vector<16x32xf32>
    %149 = vector.extract_strided_slice %130 {offsets = [48, 0], sizes = [16, 16], strides = [1, 1]} : vector<64x16xf32> to vector<16x16xf32>
    %cst_125 = arith.constant dense<0.000000e+00> : vector<16x8xf32>
    %150 = tpu.matmul %149, %117, %cst_125 {dimension_numbers = #tpu.dot_dimension_numbers<[1], [0], [0], [1], [0, 0, 1, 1], [], []>} : vector<16x16xf32>, vector<16x8xf32>, vector<16x8xf32> -> vector<16x8xf32>
    %c0_126 = arith.constant 0 : index
    %c3_127 = arith.constant 3 : index
    %c0_128 = arith.constant 0 : index
    %c0_129 = arith.constant 0 : index
    %151 = vector.load %arg8[%c0_126, %c3_127, %c0_128, %c0_129] : memref<1x4x8x32xbf16, #tpu.memory_space<vmem>>, vector<1x1x8x32xbf16>
    %152 = vector.shape_cast %151 : vector<1x1x8x32xbf16> to vector<8x32xbf16>
    %153 = arith.truncf %150 : vector<16x8xf32> to vector<16x8xbf16>
    %cst_130 = arith.constant dense<0.000000e+00> : vector<16x32xf32>
    %154 = tpu.matmul %153, %152, %cst_130 {dimension_numbers = #tpu.dot_dimension_numbers<[1], [0], [0], [1], [0, 0, 1, 1], [], []>} : vector<16x8xbf16>, vector<8x32xbf16>, vector<16x32xf32> -> vector<16x32xf32>
    %155 = arith.addf %136, %142 : vector<16x32xf32>
    %156 = arith.addf %148, %154 : vector<16x32xf32>
    %157 = arith.addf %155, %156 : vector<16x32xf32>
    %c0_131 = arith.constant 0 : index
    %c0_132 = arith.constant 0 : index
    %c0_133 = arith.constant 0 : index
    %c0_134 = arith.constant 0 : index
    %158 = vector.load %arg9[%c0_131, %c0_132, %c0_133, %c0_134] : memref<1x6x1x32xf32, #tpu.memory_space<vmem>>, vector<1x1x1x32xf32>
    %159 = vector.shape_cast %158 : vector<1x1x1x32xf32> to vector<1x32xf32>
    %160 = vector.broadcast %159 : vector<1x32xf32> to vector<16x32xf32>
    %161 = arith.addf %157, %160 : vector<16x32xf32>
    %162 = arith.addf %15, %161 : vector<16x32xf32>
    %c0_135 = arith.constant 0 : index
    %c1_136 = arith.constant 1 : index
    %c0_137 = arith.constant 0 : index
    %c0_138 = arith.constant 0 : index
    %163 = vector.load %arg9[%c0_135, %c1_136, %c0_137, %c0_138] : memref<1x6x1x32xf32, #tpu.memory_space<vmem>>, vector<1x1x1x32xf32>
    %164 = vector.shape_cast %163 : vector<1x1x1x32xf32> to vector<1x32xf32>
    %c0_139 = arith.constant 0 : index
    %c2_140 = arith.constant 2 : index
    %c0_141 = arith.constant 0 : index
    %c0_142 = arith.constant 0 : index
    %165 = vector.load %arg9[%c0_139, %c2_140, %c0_141, %c0_142] : memref<1x6x1x32xf32, #tpu.memory_space<vmem>>, vector<1x1x1x32xf32>
    %166 = vector.shape_cast %165 : vector<1x1x1x32xf32> to vector<1x32xf32>
    %cst_143 = arith.constant dense<0.000000e+00> : vector<16xf32>
    %167 = vector.multi_reduction <add>, %162, %cst_143 [1] : vector<16x32xf32> to vector<16xf32>
    %168 = vector.shape_cast %167 : vector<16xf32> to vector<16x1xf32>
    %cst_144 = arith.constant 3.200000e+01 : f32
    %169 = vector.broadcast %cst_144 : f32 to vector<16x1xf32>
    %170 = arith.divf %168, %169 : vector<16x1xf32>
    %171 = vector.broadcast %170 : vector<16x1xf32> to vector<16x32xf32>
    %172 = arith.subf %162, %171 : vector<16x32xf32>
    %173 = arith.mulf %172, %172 : vector<16x32xf32>
    %cst_145 = arith.constant dense<0.000000e+00> : vector<16xf32>
    %174 = vector.multi_reduction <add>, %173, %cst_145 [1] : vector<16x32xf32> to vector<16xf32>
    %175 = vector.shape_cast %174 : vector<16xf32> to vector<16x1xf32>
    %cst_146 = arith.constant 3.200000e+01 : f32
    %176 = vector.broadcast %cst_146 : f32 to vector<16x1xf32>
    %177 = arith.divf %175, %176 : vector<16x1xf32>
    %178 = vector.broadcast %170 : vector<16x1xf32> to vector<16x32xf32>
    %179 = arith.subf %162, %178 : vector<16x32xf32>
    %cst_147 = arith.constant 9.99999974E-6 : f32
    %180 = vector.broadcast %cst_147 : f32 to vector<16x1xf32>
    %181 = arith.addf %177, %180 : vector<16x1xf32>
    %182 = math.rsqrt %181 : vector<16x1xf32>
    %183 = vector.broadcast %182 : vector<16x1xf32> to vector<16x32xf32>
    %184 = arith.mulf %179, %183 : vector<16x32xf32>
    %185 = vector.broadcast %164 : vector<1x32xf32> to vector<16x32xf32>
    %186 = arith.mulf %184, %185 : vector<16x32xf32>
    %187 = vector.broadcast %166 : vector<1x32xf32> to vector<16x32xf32>
    %188 = arith.addf %186, %187 : vector<16x32xf32>
    %c0_148 = arith.constant 0 : index
    %c0_149 = arith.constant 0 : index
    %c0_150 = arith.constant 0 : index
    %189 = vector.load %arg10[%c0_148, %c0_149, %c0_150] : memref<1x32x2048xbf16, #tpu.memory_space<vmem>>, vector<1x32x2048xbf16>
    %190 = vector.shape_cast %189 : vector<1x32x2048xbf16> to vector<32x2048xbf16>
    %191 = arith.truncf %188 : vector<16x32xf32> to vector<16x32xbf16>
    %cst_151 = arith.constant dense<0.000000e+00> : vector<16x2048xf32>
    %192 = tpu.matmul %191, %190, %cst_151 {dimension_numbers = #tpu.dot_dimension_numbers<[1], [0], [0], [1], [0, 0, 1, 1], [], []>} : vector<16x32xbf16>, vector<32x2048xbf16>, vector<16x2048xf32> -> vector<16x2048xf32>
    %c0_152 = arith.constant 0 : index
    %c0_153 = arith.constant 0 : index
    %c0_154 = arith.constant 0 : index
    %193 = vector.load %arg11[%c0_152, %c0_153, %c0_154] : memref<1x1x2048xf32, #tpu.memory_space<vmem>>, vector<1x1x2048xf32>
    %194 = vector.shape_cast %193 : vector<1x1x2048xf32> to vector<1x2048xf32>
    %195 = vector.broadcast %194 : vector<1x2048xf32> to vector<16x2048xf32>
    %196 = arith.addf %192, %195 : vector<16x2048xf32>
    %cst_155 = arith.constant 0.000000e+00 : f32
    %197 = vector.broadcast %cst_155 : f32 to vector<16x2048xf32>
    %198 = arith.maximumf %196, %197 : vector<16x2048xf32>
    %c0_156 = arith.constant 0 : index
    %c0_157 = arith.constant 0 : index
    %c0_158 = arith.constant 0 : index
    %199 = vector.load %arg12[%c0_156, %c0_157, %c0_158] : memref<1x32x2048xbf16, #tpu.memory_space<vmem>>, vector<1x32x2048xbf16>
    %200 = vector.shape_cast %199 : vector<1x32x2048xbf16> to vector<32x2048xbf16>
    %201 = arith.truncf %198 : vector<16x2048xf32> to vector<16x2048xbf16>
    %cst_159 = arith.constant dense<0.000000e+00> : vector<16x32xf32>
    %202 = tpu.matmul %201, %200, %cst_159 {dimension_numbers = #tpu.dot_dimension_numbers<[1], [1], [0], [0], [0, 0, 1, 0], [], []>} : vector<16x2048xbf16>, vector<32x2048xbf16>, vector<16x32xf32> -> vector<16x32xf32>
    %c0_160 = arith.constant 0 : index
    %c3_161 = arith.constant 3 : index
    %c0_162 = arith.constant 0 : index
    %c0_163 = arith.constant 0 : index
    %203 = vector.load %arg9[%c0_160, %c3_161, %c0_162, %c0_163] : memref<1x6x1x32xf32, #tpu.memory_space<vmem>>, vector<1x1x1x32xf32>
    %204 = vector.shape_cast %203 : vector<1x1x1x32xf32> to vector<1x32xf32>
    %205 = vector.broadcast %204 : vector<1x32xf32> to vector<16x32xf32>
    %206 = arith.addf %202, %205 : vector<16x32xf32>
    %207 = arith.addf %188, %206 : vector<16x32xf32>
    %c0_164 = arith.constant 0 : index
    %c4_165 = arith.constant 4 : index
    %c0_166 = arith.constant 0 : index
    %c0_167 = arith.constant 0 : index
    %208 = vector.load %arg9[%c0_164, %c4_165, %c0_166, %c0_167] : memref<1x6x1x32xf32, #tpu.memory_space<vmem>>, vector<1x1x1x32xf32>
    %209 = vector.shape_cast %208 : vector<1x1x1x32xf32> to vector<1x32xf32>
    %c0_168 = arith.constant 0 : index
    %c5_169 = arith.constant 5 : index
    %c0_170 = arith.constant 0 : index
    %c0_171 = arith.constant 0 : index
    %210 = vector.load %arg9[%c0_168, %c5_169, %c0_170, %c0_171] : memref<1x6x1x32xf32, #tpu.memory_space<vmem>>, vector<1x1x1x32xf32>
    %211 = vector.shape_cast %210 : vector<1x1x1x32xf32> to vector<1x32xf32>
    %cst_172 = arith.constant dense<0.000000e+00> : vector<16xf32>
    %212 = vector.multi_reduction <add>, %207, %cst_172 [1] : vector<16x32xf32> to vector<16xf32>
    %213 = vector.shape_cast %212 : vector<16xf32> to vector<16x1xf32>
    %cst_173 = arith.constant 3.200000e+01 : f32
    %214 = vector.broadcast %cst_173 : f32 to vector<16x1xf32>
    %215 = arith.divf %213, %214 : vector<16x1xf32>
    %216 = vector.broadcast %215 : vector<16x1xf32> to vector<16x32xf32>
    %217 = arith.subf %207, %216 : vector<16x32xf32>
    %218 = arith.mulf %217, %217 : vector<16x32xf32>
    %cst_174 = arith.constant dense<0.000000e+00> : vector<16xf32>
    %219 = vector.multi_reduction <add>, %218, %cst_174 [1] : vector<16x32xf32> to vector<16xf32>
    %220 = vector.shape_cast %219 : vector<16xf32> to vector<16x1xf32>
    %cst_175 = arith.constant 3.200000e+01 : f32
    %221 = vector.broadcast %cst_175 : f32 to vector<16x1xf32>
    %222 = arith.divf %220, %221 : vector<16x1xf32>
    %223 = vector.broadcast %215 : vector<16x1xf32> to vector<16x32xf32>
    %224 = arith.subf %207, %223 : vector<16x32xf32>
    %cst_176 = arith.constant 9.99999974E-6 : f32
    %225 = vector.broadcast %cst_176 : f32 to vector<16x1xf32>
    %226 = arith.addf %222, %225 : vector<16x1xf32>
    %227 = math.rsqrt %226 : vector<16x1xf32>
    %228 = vector.broadcast %227 : vector<16x1xf32> to vector<16x32xf32>
    %229 = arith.mulf %224, %228 : vector<16x32xf32>
    %230 = vector.broadcast %209 : vector<1x32xf32> to vector<16x32xf32>
    %231 = arith.mulf %229, %230 : vector<16x32xf32>
    %232 = vector.broadcast %211 : vector<1x32xf32> to vector<16x32xf32>
    %233 = arith.addf %231, %232 : vector<16x32xf32>
    %c0_177 = arith.constant 0 : index
    %c0_178 = arith.constant 0 : index
    %234 = vector.load %arg14[%c0_177, %c0_178] : memref<16x32xf32, #tpu.memory_space<vmem>>, vector<16x32xf32>
    tpu.vector_store %arg14[%c0_177, %c0_178], %233 {strides = array<i32>} : memref<16x32xf32, #tpu.memory_space<vmem>>, vector<16x32xf32>,
    %c1_i32 = arith.constant 1 : i32
    %235 = arith.cmpi eq, %arg0, %c1_i32 : i32
    %236 = arith.extui %235 : i1 to i32
    %c0_i32_179 = arith.constant 0 : i32
    %237 = arith.cmpi ne, %236, %c0_i32_179 : i32
    scf.if %237 {
      %c0_180 = arith.constant 0 : index
      %c0_181 = arith.constant 0 : index
      %238 = vector.load %arg4[%c0_180, %c0_181] : memref<32x21xbf16, #tpu.memory_space<vmem>>, vector<32x21xbf16>
      %239 = arith.truncf %233 : vector<16x32xf32> to vector<16x32xbf16>
      %cst_182 = arith.constant dense<0.000000e+00> : vector<16x21xf32>
      %240 = tpu.matmul %239, %238, %cst_182 {dimension_numbers = #tpu.dot_dimension_numbers<[1], [0], [0], [1], [0, 0, 1, 1], [], []>} : vector<16x32xbf16>, vector<32x21xbf16>, vector<16x21xf32> -> vector<16x21xf32>
      %c0_183 = arith.constant 0 : index
      %c0_184 = arith.constant 0 : index
      %241 = vector.load %arg5[%c0_183, %c0_184] : memref<1x21xf32, #tpu.memory_space<vmem>>, vector<1x21xf32>
      %242 = vector.broadcast %241 : vector<1x21xf32> to vector<16x21xf32>
      %243 = arith.addf %240, %242 : vector<16x21xf32>
      %244 = tpu.iota {dimensions = array<i32: 1>} : vector<16x21xi32>
      %c1_i32_185 = arith.constant 1 : i32
      %245 = vector.broadcast %c1_i32_185 : i32 to vector<16x21xi32>
      %246 = arith.cmpi sge, %244, %245 : vector<16x21xi32>
      %cst_186 = arith.constant 0xFF800000 : f32
      %247 = vector.broadcast %cst_186 : f32 to vector<16x21xf32>
      %248 = arith.select %246, %243, %247 : vector<16x21xi1>, vector<16x21xf32>
      %cst_187 = arith.constant dense<0xFF800000> : vector<16xf32>
      %249 = vector.multi_reduction <maximumf>, %248, %cst_187 [1] : vector<16x21xf32> to vector<16xf32>
      %250 = vector.shape_cast %249 : vector<16xf32> to vector<16x1xf32>
      %251 = vector.broadcast %250 : vector<16x1xf32> to vector<16x21xf32>
      %252 = arith.subf %248, %251 : vector<16x21xf32>
      %253 = math.exp %252 : vector<16x21xf32>
      %cst_188 = arith.constant dense<0.000000e+00> : vector<16xf32>
      %254 = vector.multi_reduction <add>, %253, %cst_188 [1] : vector<16x21xf32> to vector<16xf32>
      %255 = vector.shape_cast %254 : vector<16xf32> to vector<16x1xf32>
      %256 = vector.broadcast %255 : vector<16x1xf32> to vector<16x21xf32>
      %257 = arith.divf %253, %256 : vector<16x21xf32>
      %258 = arith.negf %243 : vector<16x21xf32>
      %259 = math.exp %258 : vector<16x21xf32>
      %cst_189 = arith.constant 1.000000e+00 : f32
      %260 = vector.broadcast %cst_189 : f32 to vector<16x21xf32>
      %261 = arith.addf %260, %259 : vector<16x21xf32>
      %262 = arith.divf %260, %261 : vector<16x21xf32>
      %263 = arith.select %246, %257, %262 : vector<16x21xi1>, vector<16x21xf32>
      %c0_190 = arith.constant 0 : index
      %c0_191 = arith.constant 0 : index
      %264 = vector.load %arg13[%c0_190, %c0_191] : memref<16x21xf32, #tpu.memory_space<vmem>>, vector<16x21xf32>
      tpu.vector_store %arg13[%c0_190, %c0_191], %263 {strides = array<i32>} : memref<16x21xf32, #tpu.memory_space<vmem>>, vector<16x21xf32>,
    } else {
    }
    return
  }
  func.func @transform_0(%arg0: i32) -> (i32, i32) {
    %c0_i32 = arith.constant 0 : i32
    %c0_i32_0 = arith.constant 0 : i32
    %c0_i32_1 = arith.constant 0 : i32
    return %c0_i32, %c0_i32_0 : i32, i32
  }
  func.func @transform_1(%arg0: i32) -> (i32, i32) {
    %c0_i32 = arith.constant 0 : i32
    %c0_i32_0 = arith.constant 0 : i32
    %c0_i32_1 = arith.constant 0 : i32
    return %c0_i32, %c0_i32_0 : i32, i32
  }
  func.func @transform_2(%arg0: i32) -> (i32, i32) {
    %c0_i32 = arith.constant 0 : i32
    %c0_i32_0 = arith.constant 0 : i32
    %c0_i32_1 = arith.constant 0 : i32
    return %c0_i32, %c0_i32_0 : i32, i32
  }
  func.func @transform_3(%arg0: i32) -> (i32, i32) {
    %c0_i32 = arith.constant 0 : i32
    %c0_i32_0 = arith.constant 0 : i32
    %c0_i32_1 = arith.constant 0 : i32
    return %c0_i32, %c0_i32_0 : i32, i32
  }
  func.func @transform_4(%arg0: i32) -> (i32, i32) {
    %c0_i32 = arith.constant 0 : i32
    %c0_i32_0 = arith.constant 0 : i32
    %c0_i32_1 = arith.constant 0 : i32
    return %c0_i32, %c0_i32_0 : i32, i32
  }
  func.func @transform_5(%arg0: i32) -> (i32, i32, i32, i32) {
    %c0_i32 = arith.constant 0 : i32
    %c0_i32_0 = arith.constant 0 : i32
    %c0_i32_1 = arith.constant 0 : i32
    %c0_i32_2 = arith.constant 0 : i32
    return %arg0, %c0_i32, %c0_i32_0, %c0_i32_1 : i32, i32, i32, i32
  }
  func.func @transform_6(%arg0: i32) -> (i32, i32, i32, i32) {
    %c0_i32 = arith.constant 0 : i32
    %c0_i32_0 = arith.constant 0 : i32
    %c0_i32_1 = arith.constant 0 : i32
    %c0_i32_2 = arith.constant 0 : i32
    return %arg0, %c0_i32, %c0_i32_0, %c0_i32_1 : i32, i32, i32, i32
  }
  func.func @transform_7(%arg0: i32) -> (i32, i32, i32, i32) {
    %c0_i32 = arith.constant 0 : i32
    %c0_i32_0 = arith.constant 0 : i32
    %c0_i32_1 = arith.constant 0 : i32
    %c0_i32_2 = arith.constant 0 : i32
    return %arg0, %c0_i32, %c0_i32_0, %c0_i32_1 : i32, i32, i32, i32
  }
  func.func @transform_8(%arg0: i32) -> (i32, i32, i32, i32) {
    %c0_i32 = arith.constant 0 : i32
    %c0_i32_0 = arith.constant 0 : i32
    %c0_i32_1 = arith.constant 0 : i32
    %c0_i32_2 = arith.constant 0 : i32
    return %arg0, %c0_i32, %c0_i32_0, %c0_i32_1 : i32, i32, i32, i32
  }
  func.func @transform_9(%arg0: i32) -> (i32, i32, i32) {
    %c0_i32 = arith.constant 0 : i32
    %c0_i32_0 = arith.constant 0 : i32
    %c0_i32_1 = arith.constant 0 : i32
    return %arg0, %c0_i32, %c0_i32_0 : i32, i32, i32
  }
  func.func @transform_10(%arg0: i32) -> (i32, i32, i32) {
    %c0_i32 = arith.constant 0 : i32
    %c0_i32_0 = arith.constant 0 : i32
    %c0_i32_1 = arith.constant 0 : i32
    return %arg0, %c0_i32, %c0_i32_0 : i32, i32, i32
  }
  func.func @transform_11(%arg0: i32) -> (i32, i32, i32) {
    %c0_i32 = arith.constant 0 : i32
    %c0_i32_0 = arith.constant 0 : i32
    %c0_i32_1 = arith.constant 0 : i32
    return %arg0, %c0_i32, %c0_i32_0 : i32, i32, i32
  }
  func.func @transform_12(%arg0: i32) -> (i32, i32) {
    %c0_i32 = arith.constant 0 : i32
    %c0_i32_0 = arith.constant 0 : i32
    %c0_i32_1 = arith.constant 0 : i32
    return %c0_i32, %c0_i32_0 : i32, i32
  }
}

</mosaic_0001>

<bundles_post_ra>
// kernel: model2_forward.1
= control target key start
LH: loop header
LB: loop body
LE: loop exit
PB: predicated region body
PF: predicated region fallthrough
CT: control target
= control target key end

     0   :  { %s5502_s0 = inlined_call_operand.vmem [shape: f32[16,128], index: 0, kind: input, shape index: {}]   ;;  %s5503_s1 = inlined_call_operand.vmem [shape: bf16[128,32], index: 1, kind: input, shape index: {}]   ;;  %s5504_s2 = inlined_call_operand.vmem [shape: f32[1,32], index: 2, kind: input, shape index: {}]   ;;  %s5505_s3 = inlined_call_operand.vmem [shape: bf16[32,21], index: 3, kind: input, shape index: {}]   ;;  %s5506_s4 = inlined_call_operand.vmem [shape: f32[1,21], index: 4, kind: input, shape index: {}]   ;;  %s5507_s5 = inlined_call_operand.vmem [shape: bf16[2,12,32,8], index: 5, kind: input, shape index: {}]   ;;  %s5508_s6 = inlined_call_operand.vmem [shape: f32[2,12,1,8], index: 6, kind: input, shape index: {}]   ;;  %s5509_s7 = inlined_call_operand.vmem [shape: bf16[2,4,8,32], index: 7, kind: input, shape index: {}]   ;;  %s5510_s8 = inlined_call_operand.vmem [shape: f32[2,6,1,32], index: 8, kind: input, shape index: {}]   ;;  %s5511_s9 = inlined_call_operand.vmem [shape: bf16[2,32,2048], index: 9, kind: input, shape index: {}]   ;;  %s5512_s10 = inlined_call_operand.vmem [shape: f32[2,1,2048], index: 10, kind: input, shape index: {}]   ;;  %s5513_s11 = inlined_call_operand.hbm [shape: bf16[2,32,2048], index: 11, kind: input, shape index: {}]   ;;  %s5514_s12 = inlined_call_operand.vmem [shape: f32[16,21], index: 12, kind: output, shape index: {}]  }
   0x1   :  { %5519 = sst [smem:[#allocation10_spill]] %s5507_s5 }
   0x2   :  { %5520 = sst [smem:[#allocation11_spill]] %s5509_s7 }
   0x3   :  { %5521 = sst [smem:[#allocation12_spill]] %s5513_s11 }
   0x4   :  { %17 = vsyncpa [#allocation4], 0 }
   0x5   :  { %19 = vsyncpa [#allocation4 + $0x1], 0  ;;  %s4834_s21 = smov 0   ;;  %s4836_s22 = smov 0  }
   0x6   :  { %s4838_s23 = smov 0   ;;  %s4840_s24 = smov 0  }
   0x7 LB: > { %5522 = sst [smem:[#allocation6_spill]] %s4748_s22  ;;  %s4853_s25 = sadd.s32 4294967295, %s4756_s24   ;;  %s4756_s24 = sphi %s4840_s24, %s5534_s24   ;;  %s4752_s23 = sphi %s4838_s23, %s5537_s23   ;;  %s4748_s22 = sphi %s4836_s22, %s5536_s22   ;;  %s4744_s21 = sphi %s4834_s21, %s5535_s21  }
   0x8   : > { %5523 = sst [smem:[#allocation7_spill]] %s4752_s23  ;;  %s4856_s26 = sadd.s32 1, %s4756_s24  }
   0x9   : > { %5524 = sst [smem:[#allocation8_spill]] %s4856_s26  ;;  %s290_s27 = ssub.s32 %s4756_s24, %s4856_s26 }
   0xa   : > { %s293_s28 = sadd.s32 1, %s4752_s23  ;;  %p291_p0 = scmp.eq.s32.totalorder %s290_s27, 0 }
   0xb   : > { %p300_p1 = scmp.ne.s32.totalorder %s4752_s23, %s4748_s22  ;;  %p301_p2 = scmp.eq.s32.totalorder %s4756_s24, 0 }
   0xc   : > { %p306_p3 = scmp.ne.s32.totalorder %s4748_s22, %s4744_s21  ;;  %p307_p5 = scmp.eq.s32.totalorder %s4853_s25, 0 }
   0xd   : > { %s4866_s29 = scalar_select %p291_p0, %s4752_s23, %s293_s28  }
   0xe   : > { %p302_p4 = por %p301_p2, %p300_p1  ;;  %p4559_p6 = scmp.lt.s32.totalorder %s4756_s24, 2 }
   0xf   : > { %5525 = sst [smem:[#allocation9_spill]] %s4866_s29  ;;  %p4870_p7 = por %p307_p5, %p306_p3 }
  0x10   : > { %s411_s13 = sand.u32 1, %s4752_s23   ;;  %s4215_s15 = sshll.u32 %s4756_s24, 12 }
  0x11   : > { %s3968_s14 = sshll.u32 %s411_s13, 8  ;;  %s5527_s11 = sld [smem:[#allocation12_spill]] }
  0x12   : > { %s415_s19 = scalar_lea.vmem [#allocation3], %s3968_s14  ;;  %p4883_p8 = pnand %p4559_p6, %p302_p4 }
  0x13   : > { %s422_s20 = sshll.u32 %s415_s19, 4  ;;  %s4888_s27 = scalar_lea.sflag [#allocation4], %s411_s13  ;;  %s4881_s20 = int_to_ptr.vmem [resolvable:$true] %s422_s20 }
  0x14   : > { %p4694_p11 = pneg %p4883_p8 }
  0x17   : > { %s4879_s18 = scalar_lea.hbm %s5527_s11, %s4215_s15  ;;  %s4697_s16 = scalar_lea.hbm %s5527_s11, 8192 }
  0x18   : > { %s4692_s28 = scalar_lea.hbm %s4879_s18, 4096  ;;  %p4698_p0 = scmp.lt.u32.totalorder %s4879_s18, %s5527_s11 }
  0x19   : > { %p4693_p10 = scmp.ne.s32.totalorder %s4879_s18, %s4692_s28  ;;  %p4699_p1 = scmp.lt.u32.totalorder %s4697_s16, %s4692_s28 }
  0x1a   : > { %p4701_p3 = scmp.lt.u32.totalorder %s4692_s28, %s4879_s18 }
  0x1b   : > { %p4695_p12 = pnand %p4694_p11, %p4693_p10  ;;  %p4700_p2 = por %p4699_p1, %p4698_p0 }
  0x1d   : > { %p4696_p13 = pneg %p4695_p12  ;;  %p4702_p4 = por %p4701_p3, %p4700_p2 }
  0x1f   : > { %p4703_p5 = pnand %p4702_p4, %p4696_p13 }
  0x21   : > { %4706 = shalt.err (!%p4703_p5)
}
  0x22   : > { %s4707_s13 = scalar_lea.vmem %s4881_s20, 4096  ;;  %s4758_s14 = smov [#allocation3]  }
  0x23   : > { %p4708_p6 = scmp.ne.s32.totalorder %s4881_s20, %s4707_s13  ;;  %s4712_s15 = sshll.u32 %s4758_s14, 4  ;;  %s4713_s15 = int_to_ptr.vmem [resolvable:$false] %s4712_s15 }
  0x24   : > { %s4714_s17 = scalar_lea.vmem %s4713_s15, 8192  ;;  %p4715_p9 = scmp.lt.s32.totalorder %s4881_s20, %s4713_s15 }
  0x25   : > { %p4710_p10 = pnand %p4708_p6, %p4694_p11  ;;  %p4716_p0 = scmp.lt.s32.totalorder %s4714_s17, %s4707_s13 }
  0x27   : > { %p4711_p12 = pneg %p4710_p10  ;;  %p4717_p1 = por %p4716_p0, %p4715_p9 }
  0x29   : > { %p4718_p2 = pnand %p4717_p1, %p4711_p12 }
  0x2b   : > { %4721 = shalt.err (!%p4718_p2)
}
  0x2c   : > { %s4759_s28 = smov 1024   ;;  %s4760_s16 = smov 64  }
  0x2d   : > { %4558 = dma.hbm_to_vmem [thread:$0]  (!%p4883_p8), %s4879_s18, 4096, %s4881_s20, %s4888_s27, %s4759_s28, %s4759_s28, %s4760_s16  }
  0x2e   : > { %p430_p11 = scmp.lt.s32.totalorder %s4756_s24, 3  ;;  %p5529_p13 = scmp.ge.s32.totalorder %s4756_s24, 1 }
  0x30   : > { %p431_p3 = pnand %p5529_p13, %p430_p11 }
  0x31   : > { %s436_s19 = sand.u32 (!%p431_p3), 1, %s4748_s22  }
  0x32   : > { %434 = sbr.rel (%p431_p3) target bundleno = 3878 (0xf26), region = 68  ;;  %s3972_s13 = sshll.u32 (!%p431_p3), %s436_s19, 8 }
  0x33   : > { %s437_s14 = scalar_lea.sflag (!%p431_p3), [#allocation4], %s436_s19  ;;  %s4920_s15 = scalar_lea.vmem (!%p431_p3), [#allocation3], %s3972_s13 }
  0x39   : > { %4739 = dma.done.wait (%p4870_p7), %s437_s14, 4096  }
  0x3a   : > { %4741 = vsyncadd (%p4870_p7), %s437_s14, 4294963200  ;;  %p503_p9 = scmp.lt.s32.totalorder %s4853_s25, 1  ;;  %v531_v0 = vlaneseq  ;;  %s5530_s7 = sld [smem:[#allocation11_spill]]  ;;  %v4761_v13 = vmov -1e+30  }
  0x3b   : > { %s5531_s5 = sld [smem:[#allocation10_spill]]  ;;  %p3979_p7 = scmp.ne.s32.totalorder %s4853_s25, 0 }
  0x3c   : > { %s504_s18 = scalar_select %p503_p9, %s4853_s25, 1  ;;  %v4928_v1 = vshrl.u32 %v531_v0, 7  ;;  %v4930_v2 = vand.u32 127, %v531_v0 }
  0x3d   : > { %v4602_v16 = vld [vmem:[%s5503_s1] sm:$0xff] (!%p3979_p7)   ;;  %v4762_v17 = vmov (!%p3979_p7), 0.0   ;;  %v4603_v18 = vld [vmem:[%s5503_s1 + $0x8] sm:$0xff] (!%p3979_p7)   ;;  %vm4763_vm2 = vmmov (!%p3979_p7), 0   ;;  %v4604_v19 = vld [vmem:[%s5503_s1 + $0x10] sm:$0xff] (!%p3979_p7)   ;;  %vm668_vm3 = vcmask (!%p3979_p7), 261120  }
  0x3e   : > { %s4550_s24 = smul.u32 192, %s504_s18  ;;  %s4216_s20 = sshll.u32 %s504_s18, 4  ;;  %v533_v3 = vadd.s32 8, %v4928_v1  ;;  %v534_v4 = vcvt.s32.f32 %v4928_v1  ;;  %v538_v5 = vcvt.s32.f32 %v4930_v2  ;;  %4306 = vmatprep.subr.bf16.mxu0 (!%p3979_p7), %v4762_v17  ;;  %4322 = vmatprep.mubr.msk.bf16.mxu0 (!%p3979_p7), %vm4763_vm2, %v4762_v17  ;;  %v4605_v20 = vld [vmem:[%s5503_s1 + $0x18] sm:$0xff] (!%p3979_p7)   ;;  %v4606_v21 = vld [vmem:[%s5503_s1 + $0x20] sm:$0xff] (!%p3979_p7)   ;;  %v4607_v22 = vld [vmem:[%s5503_s1 + $0x28] sm:$0xff] (!%p3979_p7)  }
  0x3f   : > { %s4551_s21 = smul.u32 12, %s504_s18  ;;  %s4217_s23 = sshll.u32 %s504_s18, 8  ;;  %4307 = vmatpush3.bf16.msra.mxu0 (!%p3979_p7), %v4602_v16  ;;  %v4608_v23 = vld [vmem:[%s5503_s1 + $0x30] sm:$0xff] (!%p3979_p7)   ;;  %v4609_v24 = vld [vmem:[%s5503_s1 + $0x38] sm:$0xff] (!%p3979_p7)   ;;  %v553_v25 = vld [vmem:[%s5502_s0] sm:$0xff] (!%p3979_p7) }
  0x40   : > { %s4938_s17 = scalar_lea.vmem %s5530_s7, %s4216_s20  ;;  %s4552_s13 = smul.u32 6, %s504_s18  ;;  %v535_v6 = vcvt.s32.f32 %v533_v3  ;;  %v539_v7 = vsub.f32 %v534_v4, %v538_v5  ;;  %4308 = vmatprep.subr.bf16.mxu0 (!%p3979_p7), %v4762_v17  ;;  %v554_v26 = vld [vmem:[%s5502_s0 + $0x8] sm:$0xff] (!%p3979_p7)  ;;  %v3980_v28 = vld [vmem:[%s5504_s2] ss:$0 sm:$0xff] (!%p3979_p7) }
  0x41   : > { %s4943_s19 = scalar_lea.vmem %s5531_s5, %s4550_s24  ;;  %s4948_s29 = scalar_lea.vmem %s5508_s6, %s4551_s21  ;;  %v571_v27 = vpack.c.bf16 (!%p3979_p7), %v554_v26, %v553_v25 }
  0x42   : > { %s4953_s30 = scalar_lea.vmem %s5510_s8, %s4552_s13  ;;  %s4958_s28 = scalar_lea.vmem %s5511_s9, %s4217_s23  ;;  %v540_v8 = vsub.f32 %v535_v6, %v538_v5  ;;  %v541_v9 = vmul.f32 0.5, %v539_v7 }
  0x43   : > { %s4963_s5 = scalar_lea.vmem %s5512_s10, %s4216_s20  ;;  %552 = sbr.rel (%p3979_p7) target bundleno = 311 (0x137), region = 76  ;;  %4309 = vmatpush3.bf16.msra.mxu0 (!%p3979_p7), %v4603_v18 }
  0x44   : > { %v542_v10 = vmul.f32 0.5, %v540_v8  ;;  %v543_v11 = vfloor.f32 %v541_v9  ;;  %4310 = vmatprep.subr.bf16.mxu0 (!%p3979_p7), %v4762_v17 }
  0x46   : > { %v544_v12 = vfloor.f32 %v542_v10  ;;  %vm545_vm0 = vcmp.eq.f32.partialorder %v541_v9, %v543_v11 }
  0x47   : > { %v4965_v14 = vsel %vm545_vm0, 0.0, %v4761_v13  ;;  %4311 = vmatpush3.bf16.msra.mxu0 (!%p3979_p7), %v4604_v19 }
  0x48   : > { %vm546_vm1 = vcmp.eq.f32.partialorder %v542_v10, %v544_v12  ;;  %4312 = vmatprep.subr.bf16.mxu0 (!%p3979_p7), %v4762_v17 }
  0x49   : > { %v4967_v15 = vsel %vm546_vm1, 0.0, %v4761_v13 }
  0x4b   : > { %4313 = vmatpush3.bf16.msra.mxu0 %v4605_v20 }
  0x4c   : > { %4314 = vmatprep.subr.bf16.mxu0 %v4762_v17 }
  0x4f   : > { %4315 = vmatpush3.bf16.msra.mxu0 %v4606_v21 }
  0x50   : > { %4316 = vmatprep.subr.bf16.mxu0 %v4762_v17 }
  0x53   : > { %4317 = vmatpush3.bf16.msra.mxu0 %v4607_v22 }
  0x54   : > { %4318 = vmatprep.subr.bf16.mxu0 %v4762_v17 }
  0x57   : > { %4319 = vmatpush3.bf16.msra.mxu0 %v4608_v23 }
  0x58   : > { %4320 = vmatprep.subr.bf16.mxu0 %v4762_v17 }
  0x5b   : > { %4321 = vmatpush3.bf16.msra.mxu0 %v4609_v24 }
  0x5e   : > { %4323 = vmatmul.mubr.bf16.vlgmr.msra.gmra.mrb[0].mxu0 %v571_v27 }
 0x131   : > { %v661_v29 = vpop.f32.mrb[0].mxu0 }
 0x132   : > { %v662_v30 = vadd.f32 %v3980_v28, %v661_v29  ;;  %v4324_v31 = vpop.f32.mrb[1].mxu0 }
 0x133   : > { %v664_v32 = vpop.f32.mrb[2].mxu0 }
 0x134   : > { %669 = vst.msk [vmem:[#allocation2] sm:$0xff] %vm668_vm3, %v662_v30  ;;  %v665_v33 = vadd.f32 %v3980_v28, %v664_v32  ;;  %v4325_v34 = vpop.f32.mrb[3].mxu0 }
 0x136   : > { %670 = vst.msk [vmem:[#allocation2 + $0x8] sm:$0xff] %vm668_vm3, %v665_v33 }
 0x137 PF: > { %v4610_v35 = vld [vmem:[%s4943_s19 + $0x40] sm:$0xff]   ;;  %v4764_v36 = vmov 0.0   ;;  %v4611_v37 = vld [vmem:[%s4943_s19 + $0x48] sm:$0xff]   ;;  %vm4765_vm4 = vmmov 0   ;;  %vm697_vm5 = vcmask 261120   ;;  %v4618_v45 = vld [vmem:[%s4943_s19 + $0x10] sm:$0xff]  }
 0x138   : > { %4334 = vmatprep.subr.bf16.mxu1 %v4764_v36  ;;  %4326 = vmatprep.subr.bf16.mxu0 %v4764_v36  ;;  %v4612_v40 = vld [vmem:[%s4943_s19] sm:$0xff]   ;;  %v4613_v41 = vld [vmem:[%s4943_s19 + $0x8] sm:$0xff]   ;;  %v4619_v46 = vld [vmem:[%s4943_s19 + $0x18] sm:$0xff]   ;;  %vm874_vm6 = vcmask 64512   ;;  %vm1817_vm8 = vcmask 130048   ;;  %vm2076_vm9 = vcmask 1043456  }
 0x139   : > { %4335 = vmatpush3.bf16.msra.mxu1 %v4610_v35  ;;  %4338 = vmatprep.mubr.msk.bf16.mxu1 %vm4765_vm4, %v4764_v36  ;;  %v4614_v43 = vld [vmem:[%s4943_s19 + $0x80] sm:$0xff]   ;;  %v4616_v44 = vld [vmem:[%s4943_s19 + $0x88] sm:$0xff]   ;;  %vm5050_vm7 = vmpackc.low %vm874_vm6, %vm874_vm6  ;;  %p4206_p8 = scmp.ne.s32.totalorder %s4853_s25, 1 }
 0x13a   : > { %4336 = vmatprep.subr.bf16.mxu1 %v4764_v36  ;;  %4330 = vmatprep.mubr.msk.bf16.mxu0 %vm4765_vm4, %v4764_v36  ;;  %v3998_v47 = vld [vmem:[%s4948_s29 + $0x4] ss:$0 sm:$0xff]  ;;  %v3989_v50 = vld [vmem:[%s4948_s29] ss:$0 sm:$0xff]  ;;  %v4615_v63 = vld [vmem:[%s4943_s19 + $0x50] sm:$0xff]   ;;  %vm4768_vm10 = vmmov (!%p4206_p8), 0  }
 0x13b   : > { %v5009_v38 = vld [vmem:[#allocation2] sm:$0xff]  ;;  %4327 = vmatpush3.bf16.msra.mxu0 %v4612_v40  ;;  %v4617_v0 = vld [vmem:[%s4943_s19 + $0x58] sm:$0xff]   ;;  %v4007_v3 = vld [vmem:[%s4948_s29 + $0x8] ss:$0 sm:$0xff]  ;;  %vm3812_vm11 = vcmp.ge.s32.totalorder (!%p4206_p8), %v4930_v2, 1  ;;  %vm3815_vm12 = vcmask (!%p4206_p8), 171008  }
 0x13c   : > { %4328 = vmatprep.subr.bf16.mxu0 %v4764_v36  ;;  %v4020_v11 = vld [vmem:[%s4948_s29 + $0x1] ss:$0 sm:$0xff]  ;;  %v4620_v20 = vld [vmem:[%s4943_s19 + $0x90] sm:$0xff]   ;;  %v4622_v21 = vld [vmem:[%s4943_s19 + $0x98] sm:$0xff]  }
 0x13d   : > { %v5011_v39 = vld [vmem:[#allocation2 + $0x8] sm:$0xff]  ;;  %4337 = vmatpush3.bf16.msra.mxu1 %v4611_v37  ;;  %v4624_v22 = vld [vmem:[%s4943_s19 + $0x20] sm:$0xff]  }
 0x13e   : > { %v5020_v42 = vpack.c.bf16 %v5011_v39, %v5009_v38  ;;  %v4625_v23 = vld [vmem:[%s4943_s19 + $0x28] sm:$0xff]   ;;  %v4626_v24 = vld [vmem:[%s4943_s19 + $0xa0] sm:$0xff]  }
 0x13f   : > { %4329 = vmatpush3.bf16.msra.mxu0 %v4613_v41  ;;  %v4627_v25 = vld [vmem:[%s4943_s19 + $0xa8] sm:$0xff]   ;;  %v4029_v28 = vld [vmem:[%s4948_s29 + $0x5] ss:$0 sm:$0xff]  ;;  %v4628_v41 = vld [vmem:[%s4943_s19 + $0x30] sm:$0xff]  }
 0x140   : > { %4339 = vmatmul.mubr.msk.bf16.vlgmr.msra.gmra.mrb[0].mxu1 %vm697_vm5, %v5020_v42  ;;  %4342 = vmatprep.subr.bf16.mxu0 %v4764_v36  ;;  %v4621_v37 = vld [vmem:[%s4943_s19 + $0x60] sm:$0xff]   ;;  %v4623_v40 = vld [vmem:[%s4943_s19 + $0x68] sm:$0xff]  }
 0x142   : > { %4331 = vmatmul.mubr.msk.bf16.vlgmr.msra.gmra.mrb[0].mxu0 %vm697_vm5, %v5020_v42 }
 0x143   : > { %4346 = vmatprep.mubr.msk.bf16.mxu0 %vm4765_vm4, %v4764_v36  ;;  %4343 = vmatpush3.bf16.msra.mxu0 %v4614_v43  ;;  %v4629_v43 = vld [vmem:[%s4943_s19 + $0x38] sm:$0xff]  }
 0x144   : > { %4344 = vmatprep.subr.bf16.mxu0 %v4764_v36 }
 0x147   : > { %4345 = vmatpush3.bf16.msra.mxu0 %v4616_v44  ;;  %v4038_v44 = vld [vmem:[%s4948_s29 + $0x9] ss:$0 sm:$0xff] }
 0x148   : > { %4357 = vmatprep.subr.bf16.mxu0 %v4764_v36 }
 0x14a   : > { %4347 = vmatmul.mubr.msk.bf16.vlgmr.msra.gmra.mrb[4].mxu0 %vm697_vm5, %v5020_v42 }
 0x14b   : > { %4358 = vmatpush3.bf16.msra.mxu0 %v4618_v45  ;;  %4361 = vmatprep.mubr.msk.bf16.mxu0 %vm4765_vm4, %v4764_v36  ;;  %v4630_v45 = vld [vmem:[%s4943_s19 + $0xb0] sm:$0xff]  }
 0x14c   : > { %4359 = vmatprep.subr.bf16.mxu0 %v4764_v36 }
 0x14f   : > { %4360 = vmatpush3.bf16.msra.mxu0 %v4619_v46 }
 0x150   : > { %4373 = vmatprep.subr.bf16.mxu0 %v4764_v36 }
 0x152   : > { %4362 = vmatmul.mubr.msk.bf16.vlgmr.msra.gmra.mrb[8].mxu0 %vm697_vm5, %v5020_v42 }
 0x153   : > { %4377 = vmatprep.mubr.msk.bf16.mxu0 %vm4765_vm4, %v4764_v36  ;;  %4374 = vmatpush3.bf16.msra.mxu0 %v4620_v20 }
 0x154   : > { %4375 = vmatprep.subr.bf16.mxu0 %v4764_v36 }
 0x157   : > { %4376 = vmatpush3.bf16.msra.mxu0 %v4622_v21 }
 0x158   : > { %4388 = vmatprep.subr.bf16.mxu0 %v4764_v36 }
 0x15a   : > { %4378 = vmatmul.mubr.msk.bf16.vlgmr.msra.gmra.mrb[12].mxu0 %vm697_vm5, %v5020_v42 }
 0x15b   : > { %4389 = vmatpush3.bf16.msra.mxu0 %v4624_v22  ;;  %4392 = vmatprep.mubr.msk.bf16.mxu0 %vm4765_vm4, %v4764_v36 }
 0x15c   : > { %4390 = vmatprep.subr.bf16.mxu0 %v4764_v36 }
 0x15f   : > { %4391 = vmatpush3.bf16.msra.mxu0 %v4625_v23 }
 0x160   : > { %4404 = vmatprep.subr.bf16.mxu0 %v4764_v36 }
 0x162   : > { %4393 = vmatmul.mubr.msk.bf16.vlgmr.msra.gmra.mrb[16].mxu0 %vm697_vm5, %v5020_v42 }
 0x163   : > { %4405 = vmatpush3.bf16.msra.mxu0 %v4626_v24  ;;  %4408 = vmatprep.mubr.msk.bf16.mxu0 %vm4765_vm4, %v4764_v36 }
 0x164   : > { %4406 = vmatprep.subr.bf16.mxu0 %v4764_v36 }
 0x167   : > { %4407 = vmatpush3.bf16.msra.mxu0 %v4627_v25 }
 0x168   : > { %4419 = vmatprep.subr.bf16.mxu0 %v4764_v36 }
 0x16a   : > { %4409 = vmatmul.mubr.msk.bf16.vlgmr.msra.gmra.mrb[20].mxu0 %vm697_vm5, %v5020_v42 }
 0x16b   : > { %4423 = vmatprep.mubr.msk.bf16.mxu0 %vm4765_vm4, %v4764_v36  ;;  %4420 = vmatpush3.bf16.msra.mxu0 %v4628_v41 }
 0x16c   : > { %4421 = vmatprep.subr.bf16.mxu0 %v4764_v36 }
 0x16f   : > { %4422 = vmatpush3.bf16.msra.mxu0 %v4629_v43 }
 0x170   : > { %4435 = vmatprep.subr.bf16.mxu0 %v4764_v36 }
 0x172   : > { %4424 = vmatmul.mubr.msk.bf16.vlgmr.msra.gmra.mrb[24].mxu0 %vm697_vm5, %v5020_v42 }
 0x173   : > { %4436 = vmatpush3.bf16.msra.mxu0 %v4630_v45  ;;  %4439 = vmatprep.mubr.msk.bf16.mxu0 %vm4765_vm4, %v4764_v36 }
 0x174   : > { %4437 = vmatprep.subr.bf16.mxu0 %v4764_v36 }
 0x213   : > { %v801_v48 = vpop.f32.mrb[0].mxu1 }
 0x214   : > { %v4340_v49 = vpop.f32.mrb[1].mxu1  ;;  %v802_v52 = vadd.f32 %v3998_v47, %v801_v48 }
 0x215   : > { %v804_v51 = vpop.f32.mrb[2].mxu1  ;;  %v735_v55 = vpop.f32.mrb[0].mxu0 }
 0x216   : > { %v805_v53 = vadd.f32 %v3998_v47, %v804_v51  ;;  %v4341_v54 = vpop.f32.mrb[3].mxu1  ;;  %v736_v57 = vadd.f32 %v3989_v50, %v735_v55  ;;  %v4332_v58 = vpop.f32.mrb[1].mxu0 }
 0x217   : > { %v738_v60 = vpop.f32.mrb[2].mxu0  ;;  %v4051_v54 = vld [vmem:[%s4948_s29 + $0x2] ss:$0 sm:$0xff] }
 0x218   : > { %v4510_v59 = vpack.c.bf16 %v805_v53, %v802_v52  ;;  %v4333_v61 = vpop.f32.mrb[3].mxu0  ;;  %4354 = vmatprep.mubr.msk.f32.mxu1 %vm874_vm6, %v736_v57  ;;  %v739_v62 = vadd.f32 %v3989_v50, %v738_v60  ;;  %v4631_v50 = vld [vmem:[%s4943_s19 + $0xb8] sm:$0xff]  }
 0x219   : > { %4438 = vmatpush3.bf16.msra.mxu0 %v4631_v50 }
 0x21a   : > { %4512 = vmatprep.subr.msk.bf16.mxu1 %vm5050_vm7, %v4510_v59 }
 0x21b   : > { %4515 = vmatpush3.bf16.xpose.msk.msra.mxu1 %vm5050_vm7, %v4510_v59 }
 0x21c   : > { %4365 = vmatprep.subr.bf16.mxu1 %v4764_v36  ;;  %4440 = vmatmul.mubr.msk.bf16.vlgmr.msra.gmra.mrb[28].mxu0 %vm697_vm5, %v5020_v42 }
 0x21d   : > { %v867_v4 = vpop.f32.mrb[4].mxu0 }
 0x21e   : > { %v868_v5 = vadd.f32 %v4007_v3, %v867_v4  ;;  %v4348_v6 = vpop.f32.mrb[5].mxu0 }
 0x21f   : > { %v870_v7 = vpop.f32.mrb[6].mxu0 }
 0x220   : > { %v871_v8 = vadd.f32 %v4007_v3, %v870_v7  ;;  %v4349_v9 = vpop.f32.mrb[7].mxu0 }
 0x222   : > { %4355 = vmatmul.mubr.msk.f32.vlgmr.msra.gmra.mrb[4].mxu1 %vm874_vm6, %v739_v62  ;;  %v5069_v10 = vpack.c.bf16 %v871_v8, %v868_v5  ;;  %v4060_v5 = vld [vmem:[%s4948_s29 + $0x6] ss:$0 sm:$0xff] }
 0x223   : > { %4366 = vmatpush3.bf16.msra.mxu1 %v4615_v63  ;;  %4369 = vmatprep.mubr.msk.bf16.mxu1 %vm4765_vm4, %v4764_v36 }
 0x224   : > { %4367 = vmatprep.subr.bf16.mxu1 %v4764_v36 }
 0x225   : > { %v1021_v12 = vpop.f32.mrb[8].mxu0 }
 0x226   : > { %v1022_v13 = vadd.f32 %v4020_v11, %v1021_v12  ;;  %v4363_v16 = vpop.f32.mrb[9].mxu0 }
 0x227   : > { %4368 = vmatpush3.bf16.msra.mxu1 %v4617_v0  ;;  %v1024_v17 = vpop.f32.mrb[10].mxu0 }
 0x228   : > { %v1025_v18 = vadd.f32 %v4020_v11, %v1024_v17  ;;  %v4364_v19 = vpop.f32.mrb[11].mxu0  ;;  %v4632_v17 = vld [vmem:[%s4943_s19 + $0x70] sm:$0xff]  }
 0x229   : > { %v4069_v19 = vld [vmem:[%s4948_s29 + $0xa] ss:$0 sm:$0xff] }
 0x22a   : > { %4370 = vmatmul.mubr.msk.bf16.vlgmr.msra.gmra.mrb[8].mxu1 %vm697_vm5, %v5020_v42 }
 0x22b   : > { %4385 = vmatprep.mubr.msk.f32.mxu1 %vm874_vm6, %v1022_v13 }
 0x22d   : > { %v1153_v46 = vpop.f32.mrb[12].mxu0 }
 0x22e   : > { %v1154_v47 = vadd.f32 %v4038_v44, %v1153_v46  ;;  %v4379_v48 = vpop.f32.mrb[13].mxu0 }
 0x22f   : > { %v1156_v49 = vpop.f32.mrb[14].mxu0 }
 0x230   : > { %v1157_v51 = vadd.f32 %v4038_v44, %v1156_v49  ;;  %v4380_v52 = vpop.f32.mrb[15].mxu0  ;;  %v4091_v44 = vld [vmem:[%s4948_s29 + $0x7] ss:$0 sm:$0xff] }
 0x232   : > { %v4538_v53 = vpack.c.bf16 %v1157_v51, %v1154_v47 }
 0x234   : > { %4539 = vmatprep.subr.bf16.mxu0 %v4538_v53 }
 0x235   : > { %v1306_v55 = vpop.f32.mrb[16].mxu0  ;;  %4541 = vmatpush3.bf16.msra.mxu0 %v4538_v53 }
 0x236   : > { %v1307_v57 = vadd.f32 %v4051_v54, %v1306_v55  ;;  %v4394_v58 = vpop.f32.mrb[17].mxu0 }
 0x237   : > { %v1309_v59 = vpop.f32.mrb[18].mxu0 }
 0x238   : > { %v1310_v60 = vadd.f32 %v4051_v54, %v1309_v59  ;;  %v4395_v61 = vpop.f32.mrb[19].mxu0 }
 0x23d   : > { %v1438_v20 = vpop.f32.mrb[20].mxu0 }
 0x23e   : > { %v4410_v21 = vpop.f32.mrb[21].mxu0  ;;  %v1439_v22 = vadd.f32 %v4069_v19, %v1438_v20 }
 0x23f   : > { %v1441_v23 = vpop.f32.mrb[22].mxu0 }
 0x240   : > { %v1442_v24 = vadd.f32 %v4069_v19, %v1441_v23  ;;  %v4411_v25 = vpop.f32.mrb[23].mxu0 }
 0x2f5   : > { %v5097_v26 = vpop.f32.mrb[4].mxu1 }
 0x2f6   : > { %v5099_v27 = vpop.f32.mrb[5].mxu1 }
 0x2fd   : > { %v1087_v29 = vpop.f32.mrb[8].mxu1 }
 0x2fe   : > { %v4371_v30 = vpop.f32.mrb[9].mxu1  ;;  %v1088_v32 = vadd.f32 %v4029_v28, %v1087_v29  ;;  %v4082_v29 = vld [vmem:[%s4948_s29 + $0x3] ss:$0 sm:$0xff] }
 0x2ff   : > { %v1090_v31 = vpop.f32.mrb[10].mxu1  ;;  %v1591_v30 = vpop.f32.mrb[24].mxu0 }
 0x300   : > { %v1091_v33 = vadd.f32 %v4029_v28, %v1090_v31  ;;  %v4372_v34 = vpop.f32.mrb[11].mxu1  ;;  %v5156_v28 = vpack.c.bf16 %v1442_v24, %v1439_v22  ;;  %v1592_v31 = vadd.f32 %v4082_v29, %v1591_v30 }
 0x302   : > { %v4516_v35 = vpack.c.bf16 %v1091_v33, %v1088_v32  ;;  %4543 = vmatprep.subr.bf16.mxu0 %v5156_v28  ;;  %v4425_v32 = vpop.f32.mrb[25].mxu0 }
 0x303   : > { %v1594_v33 = vpop.f32.mrb[26].mxu0 }
 0x304   : > { %4518 = vmatprep.subr.msk.bf16.mxu1 %vm5050_vm7, %v4516_v35  ;;  %v1595_v34 = vadd.f32 %v4082_v29, %v1594_v33 }
 0x305   : > { %4521 = vmatpush3.bf16.xpose.msk.msra.mxu1 %vm5050_vm7, %v4516_v35  ;;  %v4426_v35 = vpop.f32.mrb[27].mxu0 }
 0x306   : > { %4396 = vmatprep.subr.bf16.mxu1 %v4764_v36 }
 0x30c   : > { %4386 = vmatmul.mubr.msk.f32.vlgmr.msra.gmra.mrb[6].mxu1 %vm874_vm6, %v1025_v18  ;;  %v4633_v18 = vld [vmem:[%s4943_s19 + $0x78] sm:$0xff]  }
 0x30d   : > { %4397 = vmatpush3.bf16.msra.mxu1 %v4621_v37  ;;  %4400 = vmatprep.mubr.msk.bf16.mxu1 %vm4765_vm4, %v4764_v36 }
 0x30e   : > { %4398 = vmatprep.subr.bf16.mxu1 %v4764_v36 }
 0x311   : > { %4399 = vmatpush3.bf16.msra.mxu1 %v4623_v40 }
 0x314   : > { %4401 = vmatmul.mubr.msk.bf16.vlgmr.msra.gmra.mrb[12].mxu1 %vm697_vm5, %v5020_v42 }
 0x315   : > { %4416 = vmatprep.mubr.msk.f32.mxu1 %vm874_vm6, %v1307_v57 }
 0x3df   : > { %v4387_v62 = vpop.f32.mrb[6].mxu1 }
 0x3e0   : > { %v1238_v63 = vpop.f32.mrb[7].mxu1  ;;  %v5135_v3 = vadd.f32 %v4387_v62, %v4967_v15 }
 0x3e1   : > { %v5132_v0 = vadd.f32 %v1238_v63, %v4965_v14 }
 0x3e2   : > { %v1827_v7 = vsel %vm1817_vm8, %v5135_v3, -inf }
 0x3e3   : > { %v1824_v4 = vsel %vm1817_vm8, %v5132_v0, -inf }
 0x3e4   : > { %1825 = vmax.xlane.f32.xlu0 %v1824_v4 }
 0x3e7   : > { %v1372_v6 = vpop.f32.mrb[12].mxu1 }
 0x3e8   : > { %v4402_v8 = vpop.f32.mrb[13].mxu1  ;;  %1828 = vmax.xlane.f32.xlu0 %v1827_v7  ;;  %v1373_v11 = vadd.f32 %v4060_v5, %v1372_v6 }
 0x3e9   : > { %v1375_v9 = vpop.f32.mrb[14].mxu1  ;;  %v954_v8 = vadd.f32 %v5099_v27, %v4965_v14 }
 0x3ea   : > { %v1376_v12 = vadd.f32 %v4060_v5, %v1375_v9  ;;  %v4403_v13 = vpop.f32.mrb[15].mxu1 }
 0x3eb   : > { %v1818_v13 = vsel %vm1817_vm8, %v954_v8, -inf }
 0x3ec   : > { %v4522_v16 = vpack.c.bf16 %v1376_v12, %v1373_v11 }
 0x3ee   : > { %4524 = vmatprep.subr.msk.bf16.mxu1 %vm5050_vm7, %v4522_v16 }
 0x3ef   : > { %4527 = vmatpush3.bf16.xpose.msk.msra.mxu1 %vm5050_vm7, %v4522_v16 }
 0x3f0   : > { %4427 = vmatprep.subr.bf16.mxu1 %v4764_v36 }
 0x3f6   : > { %4417 = vmatmul.mubr.msk.f32.vlgmr.msra.gmra.mrb[16].mxu1 %vm874_vm6, %v1310_v60 }
 0x3f7   : > { %4428 = vmatpush3.bf16.msra.mxu1 %v4632_v17  ;;  %4431 = vmatprep.mubr.msk.bf16.mxu1 %vm4765_vm4, %v4764_v36 }
 0x3f8   : > { %4429 = vmatprep.subr.bf16.mxu1 %v4764_v36 }
 0x3fb   : > { %4430 = vmatpush3.bf16.msra.mxu1 %v4633_v18 }
 0x3fe   : > { %4432 = vmatmul.mubr.msk.bf16.vlgmr.msra.gmra.mrb[20].mxu1 %vm697_vm5, %v5020_v42 }
 0x3ff   : > { %4447 = vmatprep.mubr.msk.f32.mxu1 %vm874_vm6, %v1592_v31 }
 0x471   : > { %v1826_v53 = vpop.xlane.xlu0 %1825 }
 0x472   : > { %v1844_v58 = vsub.f32 %v5132_v0, %v1826_v53 }
 0x474   : > { %v1854_v56 = vmul.f32 1.442695, %v1844_v58  ;;  %v1723_v58 = vpop.f32.mrb[28].mxu0 }
 0x475   : > { %v1829_v55 = vpop.xlane.xlu0 %1828 }
 0x476   : > { %v1845_v57 = vsub.f32 %v5135_v3, %v1829_v55  ;;  %v959_v3 = vadd.f32 %v5097_v26, %v4967_v15 }
 0x478   : > { %v1856_v60 = vmul.f32 1.442695, %v1845_v57  ;;  %v1821_v11 = vsel %vm1817_vm8, %v959_v3, -inf }
 0x47a   : > { %4634 = vpow2.f32 %v1856_v60  ;;  %v4100_v60 = vld [vmem:[%s4948_s29 + $0xb] ss:$0 sm:$0xff] }
 0x47b   : > { %4636 = vpow2.f32 %v1854_v56  ;;  %v1724_v56 = vadd.f32 %v4100_v60, %v1723_v58 }
 0x484   : > { %v4635_v12 = vpop.eup %4634 }
 0x485   : > { %v4637_v16 = vpop.eup %4636 }
 0x486   : > { %v1872_v17 = vsel %vm1817_vm8, %v4637_v16, 0.0 }
 0x4c9   : > { %v4418_v42 = vpop.f32.mrb[16].mxu1 }
 0x4ca   : > { %v1523_v37 = vpop.f32.mrb[17].mxu1  ;;  %v1529_v41 = vadd.f32 %v4418_v42, %v4967_v15 }
 0x4cb   : > { %v1524_v40 = vadd.f32 %v1523_v37, %v4965_v14 }
 0x4cc   : > { %v1833_v46 = vsel %vm1817_vm8, %v1529_v41, -inf }
 0x4cd   : > { %v1830_v43 = vsel %vm1817_vm8, %v1524_v40, -inf }
 0x4ce   : > { %1831 = vmax.xlane.f32.xlu1 %v1830_v43 }
 0x4d1   : > { %v1657_v45 = vpop.f32.mrb[20].mxu1 }
 0x4d2   : > { %v4433_v47 = vpop.f32.mrb[21].mxu1  ;;  %1834 = vmax.xlane.f32.xlu1 %v1833_v46  ;;  %v1658_v49 = vadd.f32 %v4091_v44, %v1657_v45 }
 0x4d3   : > { %v1660_v48 = vpop.f32.mrb[22].mxu1 }
 0x4d4   : > { %v1661_v50 = vadd.f32 %v4091_v44, %v1660_v48  ;;  %v4434_v51 = vpop.f32.mrb[23].mxu1 }
 0x4d6   : > { %v4528_v52 = vpack.c.bf16 %v1661_v50, %v1658_v49 }
 0x4d8   : > { %4530 = vmatprep.subr.msk.bf16.mxu1 %vm5050_vm7, %v4528_v52 }
 0x4d9   : > { %4533 = vmatpush3.bf16.xpose.msk.msra.mxu1 %vm5050_vm7, %v4528_v52 }
 0x4da   : > { %4535 = vmatprep.subr.bf16.mxu1 %v5069_v10 }
 0x4e0   : > { %4448 = vmatmul.mubr.msk.f32.vlgmr.msra.gmra.mrb[18].mxu1 %vm874_vm6, %v1595_v34 }
 0x4e1   : > { %4537 = vmatpush3.bf16.msra.mxu1 %v5069_v10 }
 0x4e2   : > { %4464 = vmatprep.subr.bf16.mxu1 %v4764_v36 }
 0x55b   : > { %v1832_v54 = vpop.xlane.xlu1 %1831 }
 0x55c   : > { %v1846_v62 = vsub.f32 %v1524_v40, %v1832_v54 }
 0x55e   : > { %v1858_v4 = vmul.f32 1.442695, %v1846_v62 }
 0x55f   : > { %v1835_v59 = vpop.xlane.xlu1 %1834 }
 0x560   : > { %v1847_v61 = vsub.f32 %v1529_v41, %v1835_v59  ;;  %v4441_v59 = vpop.f32.mrb[29].mxu0 }
 0x562   : > { %v1860_v63 = vmul.f32 1.442695, %v1847_v61  ;;  %v1726_v61 = vpop.f32.mrb[30].mxu0 }
 0x563   : > { %v1727_v62 = vadd.f32 %v4100_v60, %v1726_v61 }
 0x564   : > { %4638 = vpow2.f32 %v1860_v63  ;;  %v4442_v63 = vpop.f32.mrb[31].mxu0 }
 0x565   : > { %4640 = vpow2.f32 %v1858_v4  ;;  %v4546_v4 = vpack.c.bf16 %v1727_v62, %v1724_v56 }
 0x56e   : > { %v4639_v26 = vpop.eup %4638 }
 0x56f   : > { %v4641_v18 = vpop.eup %4640 }
 0x570   : > { %v1878_v27 = vsel %vm1817_vm8, %v4641_v18, 0.0 }
 0x5b3   : > { %v4449_v5 = vpop.f32.mrb[18].mxu1 }
 0x5b4   : > { %v1814_v10 = vadd.f32 %v4449_v5, %v4967_v15  ;;  %v1808_v6 = vpop.f32.mrb[19].mxu1  ;;  %v1875_v15 = vsel %vm1817_vm8, %v4635_v12, 0.0 }
 0x5b5   : > { %v1809_v7 = vadd.f32 %v1808_v6, %v4965_v14  ;;  %v1881_v14 = vsel %vm1817_vm8, %v4639_v26, 0.0 }
 0x5b6   : > { %v1839_v0 = vsel %vm1817_vm8, %v1814_v10, -inf }
 0x5b7   : > { %1840 = vmax.xlane.f32.xlu1 %v1839_v0  ;;  %v1836_v9 = vsel %vm1817_vm8, %v1809_v7, -inf }
 0x5b8   : > { %1837 = vmax.xlane.f32.xlu0 %v1836_v9 }
 0x5bb   : > { %1822 = vmax.xlane.f32.xlu1 %v1821_v11  ;;  %v4112_v11 = vld [vmem:[%s4938_s17 + $0x4] sm:$0xf] }
 0x5bc   : > { %1819 = vmax.xlane.f32.xlu0 %v1818_v13 }
 0x5bf   : > { %1876 = vadd.xlane.f32.xlu1 %v1875_v15  ;;  %v2078_v15 = vsel %vm2076_vm9, %v4112_v11, 0  ;;  %v2490_v11 = vld [vmem:[%s4958_s28] sm:$0xff] }
 0x5c0   : > { %1873 = vadd.xlane.f32.xlu0 %v1872_v17 }
 0x5c3   : > { %1882 = vadd.xlane.f32.xlu1 %v1881_v14 }
 0x5c4   : > { %1879 = vadd.xlane.f32.xlu0 %v1878_v27 }
 0x644   : > { %v1841_v19 = vpop.xlane.xlu1 %1840 }
 0x645   : > { %v1849_v20 = vsub.f32 %v1814_v10, %v1841_v19  ;;  %v1838_v21 = vpop.xlane.xlu0 %1837 }
 0x646   : > { %v1848_v22 = vsub.f32 %v1809_v7, %v1838_v21 }
 0x647   : > { %v1864_v23 = vmul.f32 1.442695, %v1849_v20 }
 0x648   : > { %v1862_v24 = vmul.f32 1.442695, %v1848_v22  ;;  %v1823_v25 = vpop.xlane.xlu1 %1822  ;;  %v1987_v22 = vld [vmem:[%s4938_s17] sm:$0xf] }
 0x649   : > { %4642 = vpow2.f32 %v1864_v23  ;;  %v1843_v29 = vsub.f32 %v959_v3, %v1823_v25  ;;  %v1820_v30 = vpop.xlane.xlu0 %1819  ;;  %v2340_v23 = vsel %vm2076_vm9, %v1987_v22, 0 }
 0x64a   : > { %4644 = vpow2.f32 %v1862_v24  ;;  %v1842_v31 = vsub.f32 %v954_v8, %v1820_v30  ;;  %v4116_v24 = vld [vmem:[%s4938_s17 + $0x8] sm:$0xf] }
 0x64b   : > { %v1852_v32 = vmul.f32 1.442695, %v1843_v29 }
 0x64c   : > { %v1850_v33 = vmul.f32 1.442695, %v1842_v31  ;;  %v1877_v34 = vpop.xlane.xlu1 %1876  ;;  %v2387_v31 = vsel %vm2076_vm9, %v4116_v24, 0 }
 0x64d   : > { %4646 = vpow2.f32 %v1852_v32  ;;  %v1874_v35 = vpop.xlane.xlu0 %1873 }
 0x64e   : > { %4648 = vpow2.f32 %v1850_v33 }
 0x64f   : > { %4650 = vrcp.f32 %v1877_v34 }
 0x650   : > { %4652 = vrcp.f32 %v1874_v35  ;;  %v1883_v42 = vpop.xlane.xlu1 %1882 }
 0x651   : > { %v1880_v37 = vpop.xlane.xlu0 %1879 }
 0x652   : > { %4654 = vrcp.f32 %v1880_v37 }
 0x653   : > { %v4643_v40 = vpop.eup %4642  ;;  %4656 = vrcp.f32 %v1883_v42 }
 0x654   : > { %v4645_v41 = vpop.eup %4644  ;;  %v1887_v43 = vsel %vm1817_vm8, %v4643_v40, 0.0 }
 0x655   : > { %1888 = vadd.xlane.f32.xlu1 %v1887_v43  ;;  %v1884_v44 = vsel %vm1817_vm8, %v4645_v41, 0.0 }
 0x656   : > { %1885 = vadd.xlane.f32.xlu0 %v1884_v44 }
 0x657   : > { %v4647_v45 = vpop.eup %4646 }
 0x658   : > { %v4649_v46 = vpop.eup %4648  ;;  %v1869_v47 = vsel %vm1817_vm8, %v4647_v45, 0.0 }
 0x659   : > { %v4651_v48 = vpop.eup %4650  ;;  %1870 = vadd.xlane.f32.xlu1 %v1869_v47  ;;  %v1866_v49 = vsel %vm1817_vm8, %v4649_v46, 0.0 }
 0x65a   : > { %v4653_v50 = vpop.eup %4652  ;;  %1867 = vadd.xlane.f32.xlu0 %v1866_v49  ;;  %v1901_v53 = vmul.f32 %v4651_v48, %v4635_v12 }
 0x65b   : > { %v1900_v51 = vmul.f32 %v4653_v50, %v4637_v16 }
 0x65c   : > { %v4655_v52 = vpop.eup %4654 }
 0x65d   : > { %v4657_v54 = vpop.eup %4656  ;;  %4461 = vmatprep.mubr.msk.f32.mxu0 %vm1817_vm8, %v1900_v51  ;;  %v1902_v55 = vmul.f32 %v4655_v52, %v4641_v18 }
 0x65e   : > { %4462 = vmatmul.mubr.msk.f32.vlgmr.msra.gmra.mrb[32].mxu0 %vm1817_vm8, %v1901_v53  ;;  %v1903_v57 = vmul.f32 %v4657_v54, %v4639_v26  ;;  %v4119_v26 = vld [vmem:[%s4938_s17 + $0xc] sm:$0xf] }
 0x65f   : > { %4545 = vmatpush3.bf16.msra.mxu0 %v5156_v28  ;;  %4474 = vmatprep.mubr.msk.f32.mxu0 %vm1817_vm8, %v1902_v55  ;;  %v2293_v27 = vsel %vm2076_vm9, %v4119_v26, 0  ;;  %v4123_v55 = vld [vmem:[%s4953_s30] ss:$0 sm:$0xff] }
 0x660   : > { %4547 = vmatprep.subr.bf16.mxu0 %v4546_v4 }
 0x662   : > { %4475 = vmatmul.mubr.msk.f32.vlgmr.msra.gmra.mrb[34].mxu0 %vm1817_vm8, %v1903_v57 }
 0x663   : > { %4549 = vmatpush3.bf16.msra.mxu0 %v4546_v4 }
 0x664   : > { %4490 = vmatprep.subr.bf16.mxu0 %v4764_v36 }
 0x6e2   : > { %v1889_v5 = vpop.xlane.xlu1 %1888 }
 0x6e3   : > { %4658 = vrcp.f32 %v1889_v5  ;;  %v1886_v28 = vpop.xlane.xlu0 %1885 }
 0x6e4   : > { %4660 = vrcp.f32 %v1886_v28 }
 0x6e6   : > { %v1871_v10 = vpop.xlane.xlu1 %1870 }
 0x6e7   : > { %4662 = vrcp.f32 %v1871_v10  ;;  %v1868_v6 = vpop.xlane.xlu0 %1867 }
 0x6e8   : > { %4664 = vrcp.f32 %v1868_v6 }
 0x6ed   : > { %v4659_v7 = vpop.eup %4658 }
 0x6ee   : > { %v4661_v3 = vpop.eup %4660  ;;  %v1905_v8 = vmul.f32 %v4659_v7, %v4643_v40 }
 0x6ef   : > { %v1904_v0 = vmul.f32 %v4661_v3, %v4645_v41 }
 0x6f1   : > { %v4663_v9 = vpop.eup %4662  ;;  %4481 = vmatprep.mubr.msk.f32.mxu0 %vm1817_vm8, %v1904_v0 }
 0x6f2   : > { %v4665_v12 = vpop.eup %4664  ;;  %4482 = vmatmul.mubr.msk.f32.vlgmr.msra.gmra.mrb[36].mxu0 %vm1817_vm8, %v1905_v8  ;;  %v1899_v16 = vmul.f32 %v4663_v9, %v4647_v45 }
 0x6f3   : > { %v1898_v13 = vmul.f32 %v4665_v12, %v4649_v46  ;;  %4492 = vmatprep.mubr.msk.bf16.mxu0 %vm4765_vm4, %v4764_v36  ;;  %4491 = vmatpush3.bf16.msra.mxu0 %v2340_v23  ;;  %v2498_v12 = vld [vmem:[%s4958_s28 + $0x40] sm:$0xff] }
 0x6f4   : > { %v4128_v26 = vcombine.low %v2490_v11, %v2498_v12 }
 0x6f5   : > { %4454 = vmatprep.mubr.msk.f32.mxu1 %vm1817_vm8, %v1898_v13  ;;  %v2491_v13 = vld [vmem:[%s4958_s28 + $0x8] sm:$0xff] }
 0x6f6   : > { %4455 = vmatmul.mubr.msk.f32.vlgmr.msra.gmra.mrb[24].mxu1 %vm1817_vm8, %v1899_v16  ;;  %v4129_v16 = vcombine.high %v2490_v11, %v2498_v12 }
 0x6f7   : > { %4465 = vmatpush3.bf16.msra.mxu1 %v2078_v15  ;;  %4466 = vmatprep.mubr.msk.bf16.mxu1 %vm4765_vm4, %v4764_v36  ;;  %v2499_v15 = vld [vmem:[%s4958_s28 + $0x48] sm:$0xff] }
 0x6f8   : > { %4484 = vmatprep.subr.bf16.mxu1 %v4764_v36  ;;  %2770 = vmatprep.subr.bf16.mxu0 %v4129_v16  ;;  %v2504_v16 = vld [vmem:[%s4958_s28 + $0x70] sm:$0xff] }
 0x731   : > { %v4463_v17 = vpop.f32.mrb[32].mxu0 }
 0x732   : > { %v2061_v18 = vpop.f32.mrb[33].mxu0 }
 0x733   : > { %v2072_v14 = vpack.c.bf16 %v4463_v17, %v2061_v18  ;;  %v4130_v17 = vcombine.low %v2491_v13, %v2499_v15  ;;  %v4131_v18 = vcombine.high %v2491_v13, %v2499_v15  ;;  %v2496_v13 = vld [vmem:[%s4958_s28 + $0x30] sm:$0xff]  ;;  %v2497_v15 = vld [vmem:[%s4958_s28 + $0x38] sm:$0xff] }
 0x735   : > { %4467 = vmatmul.mubr.msk.bf16.vlgmr.msra.gmra.mrb[28].mxu1 %vm874_vm6, %v2072_v14  ;;  %v4476_v19 = vpop.f32.mrb[34].mxu0  ;;  %v2506_v14 = vld [vmem:[%s4958_s28 + $0x80] sm:$0xff] }
 0x736   : > { %v2193_v20 = vpop.f32.mrb[35].mxu0  ;;  %4485 = vmatpush3.bf16.msra.mxu1 %v2293_v27  ;;  %4486 = vmatprep.mubr.msk.bf16.mxu1 %vm4765_vm4, %v4764_v36  ;;  %v2514_v27 = vld [vmem:[%s4958_s28 + $0xc0] sm:$0xff] }
 0x737   : > { %v2204_v21 = vpack.c.bf16 %v4476_v19, %v2193_v20  ;;  %4496 = vmatprep.subr.bf16.mxu1 %v4764_v36  ;;  %v2507_v19 = vld [vmem:[%s4958_s28 + $0x88] sm:$0xff]  ;;  %v4145_v20 = vcombine.high %v2506_v14, %v2514_v27  ;;  %v4144_v22 = vcombine.low %v2506_v14, %v2514_v27  ;;  %v4141_v14 = vcombine.high %v2496_v13, %v2504_v16 }
 0x7c5   : > { %v4483_v25 = vpop.f32.mrb[36].mxu0 }
 0x7c6   : > { %v2277_v29 = vpop.f32.mrb[37].mxu0 }
 0x7c7   : > { %v2288_v30 = vpack.c.bf16 %v4483_v25, %v2277_v29  ;;  %v4766_v25 = vmov 0   ;;  %v2492_v29 = vld [vmem:[%s4958_s28 + $0x10] sm:$0xff] }
 0x7c9   : > { %v4456_v32 = vpop.f32.mrb[24].mxu1  ;;  %4487 = vmatmul.mubr.msk.bf16.vlgmr.msra.gmra.mrb[32].mxu1 %vm874_vm6, %v2288_v30  ;;  %v2500_v30 = vld [vmem:[%s4958_s28 + $0x50] sm:$0xff] }
 0x7ca   : > { %v1978_v33 = vpop.f32.mrb[25].mxu1  ;;  %4497 = vmatpush3.bf16.msra.mxu1 %v2387_v31  ;;  %4498 = vmatprep.mubr.msk.bf16.mxu1 %vm4765_vm4, %v4764_v36  ;;  %v2493_v31 = vld [vmem:[%s4958_s28 + $0x18] sm:$0xff] }
 0x7cb   : > { %v1988_v34 = vpack.c.bf16 %v4456_v32, %v1978_v33  ;;  %2813 = vmatprep.subr.bf16.mxu1 %v4131_v18  ;;  %v4132_v32 = vcombine.low %v2492_v29, %v2500_v30  ;;  %v4133_v33 = vcombine.high %v2492_v29, %v2500_v30 }
 0x7cd   : > { %4493 = vmatmul.mubr.msk.bf16.vlgmr.msra.gmra.mrb[40].mxu0 %vm874_vm6, %v1988_v34  ;;  %v2501_v34 = vld [vmem:[%s4958_s28 + $0x58] sm:$0xff] }
 0x7ce   : > { %2771 = vmatpush1.bf16.msra.mxu0 %v4128_v26  ;;  %2802 = vmatprep.mubr.bf16.mxu0 %v4766_v25  ;;  %v2505_v26 = vld [vmem:[%s4958_s28 + $0x78] sm:$0xff] }
 0x7cf   : > { %2772 = vmatprep.subr.bf16.mxu0 %v4145_v20  ;;  %v4143_v27 = vcombine.high %v2497_v15, %v2505_v26  ;;  %v2520_v20 = vld [vmem:[%s4958_s28 + $0xf0] sm:$0xff] }
 0x7d1   : > { %4499 = vmatmul.mubr.msk.bf16.vlgmr.msra.gmra.mrb[36].mxu1 %vm874_vm6, %v2204_v21  ;;  %v2515_v21 = vld [vmem:[%s4958_s28 + $0xc8] sm:$0xff] }
 0x7d2   : > { %2814 = vmatpush1.bf16.msra.mxu1 %v4130_v17  ;;  %v4146_v23 = vcombine.low %v2507_v19, %v2515_v21  ;;  %v4147_v24 = vcombine.high %v2507_v19, %v2515_v21  ;;  %2773 = vmatpush1.bf16.msra.mxu0 %v4144_v22  ;;  %v2512_v19 = vld [vmem:[%s4958_s28 + $0xb0] sm:$0xff]  ;;  %v2513_v21 = vld [vmem:[%s4958_s28 + $0xb8] sm:$0xff] }
 0x7d3   : > { %2845 = vmatprep.mubr.bf16.mxu1 %v4766_v25  ;;  %2856 = vmatprep.subr.bf16.mxu0 %v4133_v33  ;;  %v2521_v22 = vld [vmem:[%s4958_s28 + $0xf8] sm:$0xff]  ;;  %v4157_v29 = vcombine.high %v2512_v19, %v2520_v20 }
 0x7d4   : > { %2815 = vmatprep.subr.bf16.mxu1 %v4147_v24  ;;  %v4142_v24 = vcombine.low %v2497_v15, %v2505_v26  ;;  %v4159_v30 = vcombine.high %v2513_v21, %v2521_v22  ;;  %v3147_v33 = vld [vmem:[%s4920_s15 + $0x8] sm:$0xff] }
 0x7d6   : > { %2816 = vmatpush1.bf16.msra.mxu1 %v4146_v23  ;;  %v4140_v23 = vcombine.low %v2496_v13, %v2504_v16 }
 0x808   : > { %v2114_v35 = vpop.f32.mrb[28].mxu1 }
 0x809   : > { %v4468_v42 = vpop.f32.mrb[29].mxu1 }
 0x80a   : > { %v2117_v37 = vpop.f32.mrb[30].mxu1  ;;  %v4135_v42 = vcombine.high %v2493_v31, %v2501_v34 }
 0x80b   : > { %v4469_v40 = vpop.f32.mrb[31].mxu1 }
 0x80c   : > { %2899 = vmatprep.subr.bf16.mxu1 %v4135_v42  ;;  %v4158_v42 = vcombine.low %v2513_v21, %v2521_v22 }
 0x89c   : > { %v2329_v41 = vpop.f32.mrb[32].mxu1 }
 0x89d   : > { %v4488_v43 = vpop.f32.mrb[33].mxu1 }
 0x89e   : > { %v2332_v44 = vpop.f32.mrb[34].mxu1 }
 0x89f   : > { %v4489_v45 = vpop.f32.mrb[35].mxu1 }
 0x8a0   : > { %v2376_v46 = vpop.f32.mrb[40].mxu0 }
 0x8a1   : > { %v2377_v47 = vadd.f32 %v2376_v46, %v2114_v35  ;;  %v4494_v48 = vpop.f32.mrb[41].mxu0  ;;  %v4134_v35 = vcombine.low %v2493_v31, %v2501_v34  ;;  %v3146_v31 = vld [vmem:[%s4920_s15] sm:$0xff]  ;;  %v3155_v34 = vld [vmem:[%s4920_s15 + $0x48] sm:$0xff] }
 0x8a2   : > { %v2379_v49 = vpop.f32.mrb[42].mxu0 }
 0x8a3   : > { %v2380_v50 = vadd.f32 %v2379_v49, %v2117_v37  ;;  %v4495_v36 = vpop.f32.mrb[43].mxu0 }
 0x8a4   : > { %v2423_v51 = vpop.f32.mrb[36].mxu1 }
 0x8a5   : > { %v2424_v52 = vadd.f32 %v2423_v51, %v2329_v41  ;;  %v4500_v53 = vpop.f32.mrb[37].mxu1  ;;  %v4127_v51 = vld [vmem:[%s4953_s30 + $0x2] ss:$0 sm:$0xff] }
 0x8a6   : > { %v2426_v54 = vpop.f32.mrb[38].mxu1  ;;  %v2508_v53 = vld [vmem:[%s4958_s28 + $0x90] sm:$0xff] }
 0x8a7   : > { %v2430_v57 = vadd.f32 %v2424_v52, %v2377_v47  ;;  %v2427_v58 = vadd.f32 %v2426_v54, %v2332_v44  ;;  %v4501_v59 = vpop.f32.mrb[39].mxu1  ;;  %v4126_v47 = vld [vmem:[%s4953_s30 + $0x1] ss:$0 sm:$0xff]  ;;  %v2516_v54 = vld [vmem:[%s4958_s28 + $0xd0] sm:$0xff] }
 0x8a9   : > { %v2431_v60 = vadd.f32 %v2427_v58, %v2380_v50  ;;  %v2439_v61 = vadd.f32 %v4123_v55, %v2430_v57  ;;  %v2517_v57 = vld [vmem:[%s4958_s28 + $0xd8] sm:$0xff] }
 0x8ab   : > { %v2441_v56 = vadd.f32 %v2439_v61, %v5009_v38  ;;  %v2440_v62 = vadd.f32 %v4123_v55, %v2431_v60  ;;  %v2509_v55 = vld [vmem:[%s4958_s28 + $0x98] sm:$0xff]  ;;  %v4149_v61 = vcombine.high %v2508_v53, %v2516_v54 }
 0x8ad   : > { %v2447_v63 = vsel %vm697_vm5, %v2441_v56, 0.0  ;;  %v2442_v4 = vadd.f32 %v2440_v62, %v5011_v39  ;;  %v2494_v62 = vld [vmem:[%s4958_s28 + $0x20] sm:$0xff] }
 0x8ae   : > { %2448 = vadd.xlane.f32.xlu0 %v2447_v63  ;;  %v2502_v63 = vld [vmem:[%s4958_s28 + $0x60] sm:$0xff] }
 0x8af   : > { %v2450_v5 = vsel %vm697_vm5, %v2442_v4, 0.0 }
 0x8b0   : > { %2451 = vadd.xlane.f32.xlu1 %v2450_v5  ;;  %v2503_v5 = vld [vmem:[%s4958_s28 + $0x68] sm:$0xff] }
 0x93b   : > { %v2449_v28 = vpop.xlane.xlu0 %2448 }
 0x93c   : > { %v2454_v10 = vmul.f32 0.03125, %v2449_v28  ;;  %v4148_v28 = vcombine.low %v2508_v53, %v2516_v54  ;;  %v5320_v54 = vld [vmem:[%s4920_s15 + $0x58] sm:$0xff] }
 0x93d   : > { %v2452_v6 = vpop.xlane.xlu1 %2451 }
 0x93e   : > { %v2456_v7 = vsub.f32 %v2441_v56, %v2454_v10  ;;  %v2455_v3 = vmul.f32 0.03125, %v2452_v6  ;;  %v4151_v56 = vcombine.high %v2509_v55, %v2517_v57  ;;  %v4150_v10 = vcombine.low %v2509_v55, %v2517_v57 }
 0x93f   : > { %v4137_v6 = vcombine.high %v2494_v62, %v2502_v63 }
 0x940   : > { %v2457_v0 = vsub.f32 %v2442_v4, %v2455_v3  ;;  %v2458_v38 = vmul.f32 %v2456_v7, %v2456_v7  ;;  %v2495_v4 = vld [vmem:[%s4958_s28 + $0x28] sm:$0xff]  ;;  %v2510_v3 = vld [vmem:[%s4958_s28 + $0xa0] sm:$0xff] }
 0x942   : > { %v2460_v8 = vsel %vm697_vm5, %v2458_v38, 0.0  ;;  %v2459_v9 = vmul.f32 %v2457_v0, %v2457_v0  ;;  %v2511_v38 = vld [vmem:[%s4958_s28 + $0xa8] sm:$0xff] }
 0x943   : > { %2461 = vadd.xlane.f32.xlu0 %v2460_v8  ;;  %v2519_v8 = vld [vmem:[%s4958_s28 + $0xe8] sm:$0xff] }
 0x944   : > { %v2463_v39 = vsel %vm697_vm5, %v2459_v9, 0.0  ;;  %v4136_v9 = vcombine.low %v2494_v62, %v2502_v63  ;;  %v4155_v12 = vcombine.high %v2511_v38, %v2519_v8  ;;  %v4154_v18 = vcombine.low %v2511_v38, %v2519_v8  ;;  %v2523_v62 = vld [vmem:[%s4963_s5] sm:$0xff] }
 0x945   : > { %2464 = vadd.xlane.f32.xlu1 %v2463_v39  ;;  %v4138_v39 = vcombine.low %v2495_v4, %v2503_v5  ;;  %v2533_v63 = vsub.s32 1, %v4928_v1  ;;  %v2549_v8 = vsub.s32 5, %v4928_v1 }
 0x9d0   : > { %v2462_v37 = vpop.xlane.xlu0 %2461 }
 0x9d1   : > { %v2466_v40 = vmul.f32 0.03125, %v2462_v37 }
 0x9d2   : > { %v2465_v41 = vpop.xlane.xlu1 %2464 }
 0x9d3   : > { %v2468_v43 = vadd.f32 1e-05, %v2466_v40  ;;  %v2467_v44 = vmul.f32 0.03125, %v2465_v41  ;;  %v4173_v40 = vcombine.high %v3147_v33, %v3155_v34 }
 0x9d5   : > { %4666 = vrsqrt.f32 %v2468_v43  ;;  %v2469_v45 = vadd.f32 1e-05, %v2467_v44  ;;  %v4172_v43 = vcombine.low %v3147_v33, %v3155_v34  ;;  %v3162_v44 = vld [vmem:[%s4920_s15 + $0x80] sm:$0xff] }
 0x9d7   : > { %4668 = vrsqrt.f32 %v2469_v45  ;;  %v3163_v45 = vld [vmem:[%s4920_s15 + $0x88] sm:$0xff] }
 0x9df   : > { %v4667_v46 = vpop.eup %4666 }
 0x9e0   : > { %v2472_v48 = vmul.f32 %v4667_v46, %v2456_v7  ;;  %v4139_v7 = vcombine.high %v2495_v4, %v2503_v5  ;;  %v2541_v4 = vsub.s32 3, %v4928_v1 }
 0x9e1   : > { %v4669_v49 = vpop.eup %4668 }
 0x9e2   : > { %v2480_v50 = vmul.f32 %v4126_v47, %v2472_v48  ;;  %v2473_v36 = vmul.f32 %v4669_v49, %v2457_v0  ;;  %v2518_v0 = vld [vmem:[%s4958_s28 + $0xe0] sm:$0xff] }
 0x9e3   : > { %v4153_v11 = vcombine.high %v2510_v3, %v2518_v0  ;;  %v4152_v17 = vcombine.low %v2510_v3, %v2518_v0  ;;  %v2553_v3 = vsub.s32 6, %v4928_v1 }
 0x9e4   : > { %v2481_v52 = vmul.f32 %v4126_v47, %v2473_v36  ;;  %v5254_v58 = vadd.f32 %v4127_v51, %v2480_v50  ;;  %v3171_v47 = vld [vmem:[%s4920_s15 + $0xc8] sm:$0xff]  ;;  %v5309_v36 = vld [vmem:[%s4920_s15 + $0x10] sm:$0xff] }
 0x9e5   : > { %v4188_v49 = vcombine.low %v3163_v45, %v3171_v47  ;;  %v4189_v50 = vcombine.high %v3163_v45, %v3171_v47  ;;  %v2554_v21 = vrot.slane %v2523_v62, %v2553_v3 }
 0x9e6   : > { %v5256_v59 = vadd.f32 %v4127_v51, %v2481_v52  ;;  %v5312_v51 = vld [vmem:[%s4920_s15 + $0x50] sm:$0xff]  ;;  %v5315_v52 = vld [vmem:[%s4920_s15 + $0x18] sm:$0xff] }
 0x9e7   : > { %v4175_v53 = vcombine.high %v5309_v36, %v5312_v51  ;;  %v4174_v55 = vcombine.low %v5309_v36, %v5312_v51  ;;  %v4176_v57 = vcombine.low %v5315_v52, %v5320_v54  ;;  %v5390_v36 = vld [vmem:[%s4920_s15 + $0x60] sm:$0xff] }
 0x9e8   : > { %v5260_v60 = vpack.c.bf16 %v5256_v59, %v5254_v58 }
 0x9ea   : > { %4160 = vmatmul.mubr.msk.bf16.vlgmr.msra.gmra.mrb[44].mxu0 %vm697_vm5, %v5260_v60  ;;  %4161 = vmatmul.mubr.msk.bf16.vlgmr.msra.gmra.mrb[40].mxu1 %vm697_vm5, %v5260_v60 }
 0x9eb   : > { %2857 = vmatpush1.bf16.msra.mxu0 %v4132_v32  ;;  %2900 = vmatpush1.bf16.msra.mxu1 %v4134_v35  ;;  %v3154_v32 = vld [vmem:[%s4920_s15 + $0x40] sm:$0xff]  ;;  %v4156_v35 = vcombine.low %v2512_v19, %v2520_v20 }
 0x9ec   : > { %2858 = vmatprep.subr.bf16.mxu0 %v4149_v61  ;;  %2901 = vmatprep.subr.bf16.mxu1 %v4151_v56  ;;  %v4171_v37 = vcombine.high %v3146_v31, %v3154_v32  ;;  %v4170_v41 = vcombine.low %v3146_v31, %v3154_v32  ;;  %v2529_v61 = vsub.s32 0, %v4928_v1  ;;  %v2537_v56 = vsub.s32 2, %v4928_v1 }
 0x9ed   : > { %2888 = vmatprep.mubr.bf16.mxu0 %v4766_v25  ;;  %2931 = vmatprep.mubr.bf16.mxu1 %v4766_v25 }
 0x9ee   : > { %v2530_v5 = vrot.slane %v2523_v62, %v2529_v61 }
 0x9ef   : > { %2859 = vmatpush1.bf16.msra.mxu0 %v4148_v28  ;;  %2902 = vmatpush1.bf16.msra.mxu1 %v4150_v10  ;;  %v2538_v28 = vrot.slane %v2523_v62, %v2537_v56  ;;  %v2534_v10 = vrot.slane %v2523_v62, %v2533_v63 }
 0x9f0   : > { %2942 = vmatprep.subr.bf16.mxu0 %v4137_v6  ;;  %2985 = vmatprep.subr.bf16.mxu1 %v4139_v7  ;;  %v2542_v6 = vrot.slane %v2523_v62, %v2541_v4  ;;  %v2545_v7 = vsub.s32 4, %v4928_v1 }
 0x9f2   : > { %4162 = vmatmul.mubr.msk.bf16.vlgmr.msra.gmra.mrb[48].mxu0 %vm697_vm5, %v5260_v60  ;;  %4163 = vmatmul.mubr.msk.bf16.vlgmr.msra.gmra.mrb[44].mxu1 %vm697_vm5, %v5260_v60  ;;  %v2546_v20 = vrot.slane %v2523_v62, %v2545_v7 }
 0x9f3   : > { %2943 = vmatpush1.bf16.msra.mxu0 %v4136_v9  ;;  %2986 = vmatpush1.bf16.msra.mxu1 %v4138_v39  ;;  %v2557_v9 = vsub.s32 7, %v4928_v1  ;;  %v3174_v1 = vld [vmem:[%s4920_s15 + $0xe0] sm:$0xff] }
 0x9f4   : > { %2944 = vmatprep.subr.bf16.mxu0 %v4153_v11  ;;  %2987 = vmatprep.subr.bf16.mxu1 %v4155_v12 }
 0x9f5   : > { %2974 = vmatprep.mubr.bf16.mxu0 %v4766_v25  ;;  %3017 = vmatprep.mubr.bf16.mxu1 %v4766_v25 }
 0x9f7   : > { %2945 = vmatpush1.bf16.msra.mxu0 %v4152_v17  ;;  %2988 = vmatpush1.bf16.msra.mxu1 %v4154_v18 }
 0x9f8   : > { %3028 = vmatprep.subr.bf16.mxu0 %v4141_v14  ;;  %3071 = vmatprep.subr.bf16.mxu1 %v4143_v27 }
 0x9fa   : > { %4164 = vmatmul.mubr.msk.bf16.vlgmr.msra.gmra.mrb[52].mxu0 %vm697_vm5, %v5260_v60  ;;  %4165 = vmatmul.mubr.msk.bf16.vlgmr.msra.gmra.mrb[48].mxu1 %vm697_vm5, %v5260_v60 }
 0x9fb   : > { %3029 = vmatpush1.bf16.msra.mxu0 %v4140_v23  ;;  %3072 = vmatpush1.bf16.msra.mxu1 %v4142_v24  ;;  %v2550_v24 = vrot.slane %v2523_v62, %v2549_v8 }
 0x9fc   : > { %3030 = vmatprep.subr.bf16.mxu0 %v4157_v29  ;;  %3073 = vmatprep.subr.bf16.mxu1 %v4159_v30  ;;  %v2558_v29 = vrot.slane %v2523_v62, %v2557_v9  ;;  %v5352_v30 = vld [vmem:[%s4963_s5 + $0x8] sm:$0xff] }
 0x9fd   : > { %3060 = vmatprep.mubr.bf16.mxu0 %v4766_v25  ;;  %3103 = vmatprep.mubr.bf16.mxu1 %v4766_v25  ;;  %v3170_v25 = vld [vmem:[%s4920_s15 + $0xc0] sm:$0xff] }
 0x9fe   : > { %v4187_v46 = vcombine.high %v3162_v44, %v3170_v25  ;;  %v4186_v48 = vcombine.low %v3162_v44, %v3170_v25  ;;  %v5361_v44 = vld [vmem:[%s4920_s15 + $0x98] sm:$0xff] }
 0x9ff   : > { %3031 = vmatpush1.bf16.msra.mxu0 %v4156_v35  ;;  %3074 = vmatpush1.bf16.msra.mxu1 %v4158_v42  ;;  %v5355_v35 = vld [vmem:[%s4920_s15 + $0x90] sm:$0xff]  ;;  %v5364_v25 = vld [vmem:[%s4920_s15 + $0xd8] sm:$0xff] }
 0xa00   : > { %3362 = vmatprep.subr.bf16.mxu0 %v4171_v37  ;;  %3403 = vmatprep.subr.bf16.mxu1 %v4173_v40  ;;  %v5358_v42 = vld [vmem:[%s4920_s15 + $0xd0] sm:$0xff] }
 0xa02   : > { %4166 = vmatmul.mubr.msk.bf16.vlgmr.msra.gmra.mrb[56].mxu0 %vm697_vm5, %v5260_v60  ;;  %4167 = vmatmul.mubr.msk.bf16.vlgmr.msra.gmra.mrb[52].mxu1 %vm697_vm5, %v5260_v60  ;;  %v4177_v60 = vcombine.high %v5315_v52, %v5320_v54  ;;  %v5393_v54 = vld [vmem:[%s4920_s15 + $0x28] sm:$0xff] }
 0xa08   : > { %3363 = vmatpush1.bf16.xpose.msra.mxu0 %v4170_v41  ;;  %3404 = vmatpush1.bf16.xpose.msra.mxu1 %v4172_v43 }
 0xa09   : > { %3364 = vmatprep.subr.bf16.mxu0 %v4187_v46  ;;  %3405 = vmatprep.subr.bf16.mxu1 %v4189_v50 }
 0xa10   : > { %3365 = vmatpush1.bf16.xpose.msra.mxu0 %v4186_v48  ;;  %3406 = vmatpush1.bf16.xpose.msra.mxu1 %v4188_v49 }
 0xa11   : > { %3444 = vmatprep.subr.bf16.mxu0 %v4175_v53  ;;  %3485 = vmatprep.subr.bf16.mxu1 %v4177_v60  ;;  %v2562_v53 = vrot.slane %v5352_v30, %v2529_v61  ;;  %v2570_v61 = vrot.slane %v5352_v30, %v2537_v56  ;;  %v2574_v56 = vrot.slane %v5352_v30, %v2541_v4 }
 0xabd   : > { %v2804_v0 = vpop.f32.mrb[44].mxu0  ;;  %v2847_v38 = vpop.f32.mrb[40].mxu1 }
 0xabe   : > { %v2805_v39 = vadd.f32 %v2804_v0, %v2530_v5  ;;  %v2848_v11 = vadd.f32 %v2847_v38, %v2538_v28  ;;  %v2806_v12 = vpop.f32.mrb[45].mxu0  ;;  %v2849_v13 = vpop.f32.mrb[41].mxu1 }
 0xabf   : > { %v2807_v16 = vadd.f32 %v2806_v12, %v2534_v10  ;;  %v2850_v15 = vadd.f32 %v2849_v13, %v2542_v6  ;;  %v2808_v26 = vpop.f32.mrb[46].mxu0  ;;  %v2851_v17 = vpop.f32.mrb[42].mxu1 }
 0xac0   : > { %v2809_v18 = vadd.f32 %v2808_v26, %v2530_v5  ;;  %v2852_v14 = vadd.f32 %v2851_v17, %v2538_v28  ;;  %v2810_v27 = vpop.f32.mrb[47].mxu0  ;;  %v2853_v19 = vpop.f32.mrb[43].mxu1  ;;  %v3114_v31 = vmax.f32 %v2805_v39, 0.0  ;;  %v3116_v32 = vmax.f32 %v2848_v11, 0.0 }
 0xac1   : > { %v2811_v22 = vadd.f32 %v2810_v27, %v2534_v10  ;;  %v2854_v23 = vadd.f32 %v2853_v19, %v2542_v6  ;;  %v3115_v37 = vmax.f32 %v2807_v16, 0.0  ;;  %v3117_v40 = vmax.f32 %v2850_v15, 0.0 }
 0xac2   : > { %v3130_v33 = vmax.f32 %v2809_v18, 0.0  ;;  %v3132_v34 = vmax.f32 %v2852_v14, 0.0  ;;  %v4191_v10 = vcombine.high %v5355_v35, %v5358_v42  ;;  %v4193_v6 = vcombine.high %v5361_v44, %v5364_v25 }
 0xac3   : > { %v3131_v41 = vmax.f32 %v2811_v22, 0.0  ;;  %v3133_v43 = vmax.f32 %v2854_v23, 0.0  ;;  %v2566_v26 = vrot.slane %v5352_v30, %v2533_v63 }
 0xac4   : > { %v3178_v45 = vpack.c.bf16 %v3130_v33, %v3114_v31  ;;  %v3180_v46 = vpack.c.bf16 %v3132_v34, %v3116_v32  ;;  %v4190_v32 = vcombine.low %v5355_v35, %v5358_v42  ;;  %v4192_v33 = vcombine.low %v5361_v44, %v5364_v25 }
 0xac5   : > { %v3179_v47 = vpack.c.bf16 %v3131_v41, %v3115_v37  ;;  %v3181_v48 = vpack.c.bf16 %v3133_v43, %v3117_v40  ;;  %v2890_v49 = vpop.f32.mrb[48].mxu0  ;;  %v2933_v50 = vpop.f32.mrb[44].mxu1  ;;  %v2578_v35 = vrot.slane %v5352_v30, %v2545_v7  ;;  %v2590_v7 = vrot.slane %v5352_v30, %v2557_v9 }
 0xac6   : > { %v2891_v60 = vadd.f32 %v2890_v49, %v2546_v20  ;;  %v2934_v62 = vadd.f32 %v2933_v50, %v2554_v21  ;;  %v2892_v5 = vpop.f32.mrb[49].mxu0  ;;  %v2935_v28 = vpop.f32.mrb[45].mxu1 }
 0xac7   : > { %v2893_v0 = vadd.f32 %v2892_v5, %v2550_v24  ;;  %v2936_v38 = vadd.f32 %v2935_v28, %v2558_v29  ;;  %v2894_v39 = vpop.f32.mrb[50].mxu0  ;;  %v2937_v11 = vpop.f32.mrb[46].mxu1  ;;  %3394 = vmatprep.mubr.bf16.mxu0 %v3179_v47  ;;  %3435 = vmatprep.mubr.bf16.mxu1 %v3181_v48 }
 0xac8   : > { %v2895_v12 = vadd.f32 %v2894_v39, %v2546_v20  ;;  %v2938_v13 = vadd.f32 %v2937_v11, %v2554_v21  ;;  %v2896_v16 = vpop.f32.mrb[51].mxu0  ;;  %v2939_v15 = vpop.f32.mrb[47].mxu1  ;;  %3395 = vmatmul.mubr.bf16.vlgmr.msra.gmra.mrb[60].mxu0 %v3178_v45  ;;  %3436 = vmatmul.mubr.bf16.vlgmr.msra.gmra.mrb[56].mxu1 %v3180_v46  ;;  %v3118_v14 = vmax.f32 %v2891_v60, 0.0  ;;  %v3120_v27 = vmax.f32 %v2934_v62, 0.0  ;;  %v5387_v20 = vld [vmem:[%s4920_s15 + $0x20] sm:$0xff] }
 0xac9   : > { %v2897_v17 = vadd.f32 %v2896_v16, %v2550_v24  ;;  %v2940_v18 = vadd.f32 %v2939_v15, %v2558_v29  ;;  %3445 = vmatpush1.bf16.xpose.msra.mxu0 %v4174_v55  ;;  %3486 = vmatpush1.bf16.xpose.msra.mxu1 %v4176_v57  ;;  %v3119_v51 = vmax.f32 %v2893_v0, 0.0  ;;  %v3121_v55 = vmax.f32 %v2936_v38, 0.0  ;;  %v5396_v57 = vld [vmem:[%s4920_s15 + $0x68] sm:$0xff]  ;;  %v3166_v11 = vld [vmem:[%s4920_s15 + $0xa0] sm:$0xff] }
 0xaca   : > { %v3134_v19 = vmax.f32 %v2895_v12, 0.0  ;;  %v3136_v63 = vmax.f32 %v2938_v13, 0.0  ;;  %3446 = vmatprep.subr.bf16.mxu0 %v4191_v10  ;;  %3487 = vmatprep.subr.bf16.mxu1 %v4193_v6  ;;  %v4179_v43 = vcombine.high %v5387_v20, %v5390_v36  ;;  %v4181_v45 = vcombine.high %v5393_v54, %v5396_v57  ;;  %v3167_v13 = vld [vmem:[%s4920_s15 + $0xa8] sm:$0xff] }
 0xacb   : > { %v3135_v21 = vmax.f32 %v2897_v17, 0.0  ;;  %v3137_v52 = vmax.f32 %v2940_v18, 0.0  ;;  %v2586_v60 = vrot.slane %v5352_v30, %v2553_v3  ;;  %v2582_v62 = vrot.slane %v5352_v30, %v2549_v8  ;;  %v3175_v16 = vld [vmem:[%s4920_s15 + $0xe8] sm:$0xff] }
 0xacc   : > { %v5398_v22 = vpack.c.bf16 %v3134_v19, %v3118_v14  ;;  %v5400_v4 = vpack.c.bf16 %v3136_v63, %v3120_v27  ;;  %v4178_v17 = vcombine.low %v5387_v20, %v5390_v36  ;;  %v4180_v19 = vcombine.low %v5393_v54, %v5396_v57 }
 0xacd   : > { %v3183_v23 = vpack.c.bf16 %v3135_v21, %v3119_v51  ;;  %v3185_v24 = vpack.c.bf16 %v3137_v52, %v3121_v55  ;;  %v2976_v29 = vpop.f32.mrb[52].mxu0  ;;  %v3019_v31 = vpop.f32.mrb[48].mxu1  ;;  %v4195_v52 = vcombine.high %v3166_v11, %v3174_v1 }
 0xace   : > { %v2977_v34 = vadd.f32 %v2976_v29, %v2562_v53  ;;  %v3020_v37 = vadd.f32 %v3019_v31, %v2570_v61  ;;  %v2978_v40 = vpop.f32.mrb[53].mxu0  ;;  %v3021_v41 = vpop.f32.mrb[49].mxu1 }
 0xacf   : > { %v2979_v46 = vadd.f32 %v2978_v40, %v2566_v26  ;;  %v3022_v47 = vadd.f32 %v3021_v41, %v2574_v56  ;;  %v2980_v48 = vpop.f32.mrb[54].mxu0  ;;  %v3023_v49 = vpop.f32.mrb[50].mxu1  ;;  %3476 = vmatprep.mubr.bf16.mxu0 %v3183_v23  ;;  %3517 = vmatprep.mubr.bf16.mxu1 %v3185_v24  ;;  %v4197_v23 = vcombine.high %v3167_v13, %v3175_v16  ;;  %v3152_v41 = vld [vmem:[%s4920_s15 + $0x30] sm:$0xff] }
 0xad0   : > { %v2981_v42 = vadd.f32 %v2980_v48, %v2562_v53  ;;  %v3024_v44 = vadd.f32 %v3023_v49, %v2570_v61  ;;  %v2982_v25 = vpop.f32.mrb[55].mxu0  ;;  %v3025_v50 = vpop.f32.mrb[51].mxu1  ;;  %v3122_v53 = vmax.f32 %v2977_v34, 0.0  ;;  %v3124_v10 = vmax.f32 %v3020_v37, 0.0  ;;  %v3161_v48 = vld [vmem:[%s4920_s15 + $0x78] sm:$0xff] }
 0xad1   : > { %v2983_v5 = vadd.f32 %v2982_v25, %v2566_v26  ;;  %v3026_v28 = vadd.f32 %v3025_v50, %v2574_v56  ;;  %3447 = vmatpush1.bf16.xpose.msra.mxu0 %v4190_v32  ;;  %3488 = vmatpush1.bf16.xpose.msra.mxu1 %v4192_v33  ;;  %v3123_v0 = vmax.f32 %v2979_v46, 0.0  ;;  %v3125_v8 = vmax.f32 %v3022_v47, 0.0  ;;  %v3153_v47 = vld [vmem:[%s4920_s15 + $0x38] sm:$0xff] }
 0xad2   : > { %v3138_v6 = vmax.f32 %v2981_v42, 0.0  ;;  %v3140_v3 = vmax.f32 %v3024_v44, 0.0  ;;  %3526 = vmatprep.subr.bf16.mxu0 %v4179_v43  ;;  %3567 = vmatprep.subr.bf16.mxu1 %v4181_v45  ;;  %v3160_v43 = vld [vmem:[%s4920_s15 + $0x70] sm:$0xff]  ;;  %v4194_v42 = vcombine.low %v3166_v11, %v3174_v1  ;;  %v4196_v44 = vcombine.low %v3167_v13, %v3175_v16 }
 0xad3   : > { %v3139_v38 = vmax.f32 %v2983_v5, 0.0  ;;  %v3141_v39 = vmax.f32 %v3026_v28, 0.0  ;;  %v4183_v25 = vcombine.high %v3152_v41, %v3160_v43  ;;  %v4185_v50 = vcombine.high %v3153_v47, %v3161_v48  ;;  %v3169_v28 = vld [vmem:[%s4920_s15 + $0xb8] sm:$0xff] }
 0xad4   : > { %v5423_v61 = vpack.c.bf16 %v3138_v6, %v3122_v53  ;;  %v5425_v12 = vpack.c.bf16 %v3140_v3, %v3124_v10  ;;  %v4182_v5 = vcombine.low %v3152_v41, %v3160_v43  ;;  %v4184_v53 = vcombine.low %v3153_v47, %v3161_v48 }
 0xad5   : > { %v3187_v9 = vpack.c.bf16 %v3139_v38, %v3123_v0  ;;  %v3189_v30 = vpack.c.bf16 %v3141_v39, %v3125_v8  ;;  %v3062_v15 = vpop.f32.mrb[56].mxu0  ;;  %v3105_v26 = vpop.f32.mrb[52].mxu1  ;;  %v4169_v8 = vld [vmem:[%s4953_s30 + $0x3] ss:$0 sm:$0xff] }
 0xad6   : > { %v3063_v18 = vadd.f32 %v3062_v15, %v2578_v35  ;;  %v3106_v56 = vadd.f32 %v3105_v26, %v2586_v60  ;;  %v3064_v14 = vpop.f32.mrb[57].mxu0  ;;  %v3107_v27 = vpop.f32.mrb[53].mxu1 }
 0xad7   : > { %v3065_v63 = vadd.f32 %v3064_v14, %v2582_v62  ;;  %v3108_v51 = vadd.f32 %v3107_v27, %v2590_v7  ;;  %v3066_v55 = vpop.f32.mrb[58].mxu0  ;;  %v3109_v21 = vpop.f32.mrb[54].mxu1 }
 0xad8   : > { %v3067_v24 = vadd.f32 %v3066_v55, %v2578_v35  ;;  %v3110_v29 = vadd.f32 %v3109_v21, %v2586_v60  ;;  %3477 = vmatmul.mubr.bf16.vlgmr.msra.gmra.mrb[64].mxu0 %v5398_v22  ;;  %3518 = vmatmul.mubr.bf16.vlgmr.msra.gmra.mrb[60].mxu1 %v5400_v4  ;;  %v3068_v20 = vpop.f32.mrb[59].mxu0  ;;  %v3111_v36 = vpop.f32.mrb[55].mxu1  ;;  %v3126_v54 = vmax.f32 %v3063_v18, 0.0  ;;  %v3128_v57 = vmax.f32 %v3106_v56, 0.0  ;;  %v3168_v60 = vld [vmem:[%s4920_s15 + $0xb0] sm:$0xff] }
 0xad9   : > { %v3069_v31 = vadd.f32 %v3068_v20, %v2582_v62  ;;  %v3112_v32 = vadd.f32 %v3111_v36, %v2590_v7  ;;  %3527 = vmatpush1.bf16.xpose.msra.mxu0 %v4178_v17  ;;  %3558 = vmatprep.mubr.bf16.mxu0 %v3187_v9  ;;  %v3127_v37 = vmax.f32 %v3065_v63, 0.0  ;;  %v3129_v22 = vmax.f32 %v3108_v51, 0.0  ;;  %v3176_v62 = vld [vmem:[%s4920_s15 + $0xf0] sm:$0xff]  ;;  %v3177_v7 = vld [vmem:[%s4920_s15 + $0xf8] sm:$0xff] }
 0xada   : > { %v3142_v33 = vmax.f32 %v3067_v24, 0.0  ;;  %v3144_v34 = vmax.f32 %v3110_v29, 0.0  ;;  %3568 = vmatpush1.bf16.xpose.msra.mxu1 %v4180_v19  ;;  %3599 = vmatprep.mubr.bf16.mxu1 %v3189_v30  ;;  %v4199_v10 = vcombine.high %v3168_v60, %v3176_v62  ;;  %v4201_v6 = vcombine.high %v3169_v28, %v3177_v7 }
 0xadb   : > { %v3143_v40 = vmax.f32 %v3069_v31, 0.0  ;;  %v3145_v4 = vmax.f32 %v3112_v32, 0.0  ;;  %3528 = vmatprep.subr.bf16.mxu0 %v4195_v52  ;;  %3569 = vmatprep.subr.bf16.mxu1 %v4197_v23  ;;  %v4198_v3 = vcombine.low %v3168_v60, %v3176_v62  ;;  %v4200_v0 = vcombine.low %v3169_v28, %v3177_v7 }
 0xadc   : > { %v3190_v45 = vpack.c.bf16 %v3142_v33, %v3126_v54  ;;  %v3192_v46 = vpack.c.bf16 %v3144_v34, %v3128_v57 }
 0xadd   : > { %v3191_v49 = vpack.c.bf16 %v3143_v40, %v3127_v37  ;;  %v3193_v35 = vpack.c.bf16 %v3145_v4, %v3129_v22 }
 0xae1   : > { %3529 = vmatpush1.bf16.xpose.msra.mxu0 %v4194_v42 }
 0xae2   : > { %3570 = vmatpush1.bf16.xpose.msra.mxu1 %v4196_v44  ;;  %3608 = vmatprep.subr.bf16.mxu0 %v4183_v25 }
 0xae3   : > { %3649 = vmatprep.subr.bf16.mxu1 %v4185_v50 }
 0xae8   : > { %3559 = vmatmul.mubr.bf16.vlgmr.msra.gmra.mrb[68].mxu0 %v5423_v61 }
 0xae9   : > { %3600 = vmatmul.mubr.bf16.vlgmr.msra.gmra.mrb[64].mxu1 %v5425_v12  ;;  %3609 = vmatpush1.bf16.xpose.msra.mxu0 %v4182_v5 }
 0xaea   : > { %3640 = vmatprep.mubr.bf16.mxu0 %v3191_v49  ;;  %3650 = vmatpush1.bf16.xpose.msra.mxu1 %v4184_v53 }
 0xaeb   : > { %3681 = vmatprep.mubr.bf16.mxu1 %v3193_v35  ;;  %3610 = vmatprep.subr.bf16.mxu0 %v4199_v10 }
 0xaec   : > { %3651 = vmatprep.subr.bf16.mxu1 %v4201_v6 }
 0xaf1   : > { %3611 = vmatpush1.bf16.xpose.msra.mxu0 %v4198_v3 }
 0xaf2   : > { %3652 = vmatpush1.bf16.xpose.msra.mxu1 %v4200_v0 }
 0xaf8   : > { %3641 = vmatmul.mubr.bf16.vlgmr.msra.gmra.mrb[72].mxu0 %v3190_v45 }
 0xaf9   : > { %3682 = vmatmul.mubr.bf16.vlgmr.msra.gmra.mrb[68].mxu1 %v3192_v46 }
 0xb9b   : > { %v3396_v38 = vpop.f32.mrb[60].mxu0  ;;  %v3437_v39 = vpop.f32.mrb[56].mxu1 }
 0xb9c   : > { %v3397_v11 = vadd.f32 %v4169_v8, %v3396_v38  ;;  %v3398_v61 = vpop.f32.mrb[61].mxu0  ;;  %v3439_v1 = vpop.f32.mrb[57].mxu1 }
 0xb9d   : > { %v3399_v13 = vpop.f32.mrb[62].mxu0  ;;  %v3440_v12 = vpop.f32.mrb[58].mxu1 }
 0xb9e   : > { %v3438_v16 = vadd.f32 %v3437_v39, %v3397_v11  ;;  %v3400_v9 = vadd.f32 %v4169_v8, %v3399_v13  ;;  %v3401_v30 = vpop.f32.mrb[63].mxu0  ;;  %v3442_v15 = vpop.f32.mrb[59].mxu1 }
 0xb9f   : > { %v4205_v30 = vld [vmem:[%s4953_s30 + $0x5] ss:$0 sm:$0xff] }
 0xba0   : > { %v3441_v26 = vadd.f32 %v3440_v12, %v3400_v9  ;;  %v4204_v12 = vld [vmem:[%s4953_s30 + $0x4] ss:$0 sm:$0xff] }
 0xbab   : > { %v3478_v17 = vpop.f32.mrb[64].mxu0  ;;  %v3519_v18 = vpop.f32.mrb[60].mxu1 }
 0xbac   : > { %v3479_v56 = vadd.f32 %v3478_v17, %v3438_v16  ;;  %v3480_v14 = vpop.f32.mrb[65].mxu0  ;;  %v3521_v27 = vpop.f32.mrb[61].mxu1 }
 0xbad   : > { %v3481_v19 = vpop.f32.mrb[66].mxu0  ;;  %v3522_v63 = vpop.f32.mrb[62].mxu1  ;;  %v4674_v14 = vld [vmem:[%s5505_s3] sm:$0xff] (!%p4206_p8)   ;;  %v4767_v27 = vmov (!%p4206_p8), 0.0  }
 0xbae   : > { %v3520_v51 = vadd.f32 %v3519_v18, %v3479_v56  ;;  %v3482_v55 = vadd.f32 %v3481_v19, %v3441_v26  ;;  %v3483_v21 = vpop.f32.mrb[67].mxu0  ;;  %v3524_v52 = vpop.f32.mrb[63].mxu1  ;;  %4502 = vmatprep.subr.bf16.mxu0 (!%p4206_p8), %v4767_v27  ;;  %v4675_v19 = vld [vmem:[%s5505_s3 + $0x8] sm:$0xff] (!%p4206_p8)   ;;  %4506 = vmatprep.mubr.msk.bf16.mxu0 (!%p4206_p8), %vm4768_vm10, %v4767_v27 }
 0xbaf   : > { %4503 = vmatpush3.bf16.msra.mxu0 (!%p4206_p8), %v4674_v14 }
 0xbb0   : > { %v3523_v23 = vadd.f32 %v3522_v63, %v3482_v55  ;;  %4504 = vmatprep.subr.bf16.mxu0 (!%p4206_p8), %v4767_v27 }
 0xbb3   : > { %4505 = vmatpush3.bf16.msra.mxu0 (!%p4206_p8), %v4675_v19 }
 0xbbb   : > { %v3560_v24 = vpop.f32.mrb[68].mxu0 }
 0xbbc   : > { %v3561_v29 = vadd.f32 %v3560_v24, %v3520_v51  ;;  %v3601_v20 = vpop.f32.mrb[64].mxu1  ;;  %v3562_v36 = vpop.f32.mrb[69].mxu0  ;;  %v4207_v51 = vld [vmem:[%s5506_s4] ss:$0 sm:$0xff] (!%p4206_p8) }
 0xbbd   : > { %v3603_v31 = vpop.f32.mrb[65].mxu1  ;;  %v3563_v32 = vpop.f32.mrb[70].mxu0 }
 0xbbe   : > { %v3602_v54 = vadd.f32 %v3601_v20, %v3561_v29  ;;  %v3564_v57 = vadd.f32 %v3563_v32, %v3523_v23  ;;  %v3604_v33 = vpop.f32.mrb[66].mxu1  ;;  %v3565_v34 = vpop.f32.mrb[71].mxu0 }
 0xbbf   : > { %v3606_v37 = vpop.f32.mrb[67].mxu1 }
 0xbc0   : > { %v3605_v22 = vadd.f32 %v3604_v33, %v3564_v57 }
 0xbcb   : > { %v3642_v40 = vpop.f32.mrb[72].mxu0 }
 0xbcc   : > { %v3643_v4 = vadd.f32 %v3642_v40, %v3602_v54  ;;  %v3683_v41 = vpop.f32.mrb[68].mxu1  ;;  %v3644_v43 = vpop.f32.mrb[73].mxu0 }
 0xbcd   : > { %v3685_v45 = vpop.f32.mrb[69].mxu1  ;;  %v3645_v46 = vpop.f32.mrb[74].mxu0 }
 0xbce   : > { %v3684_v47 = vadd.f32 %v3683_v41, %v3643_v4  ;;  %v3646_v48 = vadd.f32 %v3645_v46, %v3605_v22  ;;  %v3686_v49 = vpop.f32.mrb[70].mxu1  ;;  %v3647_v35 = vpop.f32.mrb[75].mxu0 }
 0xbcf   : > { %v3688_v42 = vpop.f32.mrb[71].mxu1 }
 0xbd0   : > { %v3687_v44 = vadd.f32 %v3686_v49, %v3646_v48  ;;  %v3690_v25 = vadd.f32 %v3684_v47, %v5254_v58 }
 0xbd2   : > { %v3696_v50 = vsel %vm697_vm5, %v3690_v25, 0.0  ;;  %v3691_v60 = vadd.f32 %v3687_v44, %v5256_v59 }
 0xbd3   : > { %3697 = vadd.xlane.f32.xlu0 %v3696_v50 }
 0xbd4   : > { %v3699_v62 = vsel %vm697_vm5, %v3691_v60, 0.0 }
 0xbd5   : > { %3700 = vadd.xlane.f32.xlu1 %v3699_v62 }
 0xc60   : > { %v3698_v5 = vpop.xlane.xlu0 %3697 }
 0xc61   : > { %v3702_v28 = vmul.f32 0.03125, %v3698_v5 }
 0xc62   : > { %v3701_v7 = vpop.xlane.xlu1 %3700 }
 0xc63   : > { %v3704_v53 = vsub.f32 %v3690_v25, %v3702_v28  ;;  %v3703_v10 = vmul.f32 0.03125, %v3701_v7 }
 0xc65   : > { %v3705_v6 = vsub.f32 %v3691_v60, %v3703_v10  ;;  %v3706_v3 = vmul.f32 %v3704_v53, %v3704_v53 }
 0xc67   : > { %v3708_v0 = vsel %vm697_vm5, %v3706_v3, 0.0  ;;  %v3707_v8 = vmul.f32 %v3705_v6, %v3705_v6 }
 0xc68   : > { %3709 = vadd.xlane.f32.xlu0 %v3708_v0 }
 0xc69   : > { %v3711_v58 = vsel %vm697_vm5, %v3707_v8, 0.0 }
 0xc6a   : > { %3712 = vadd.xlane.f32.xlu1 %v3711_v58 }
 0xcf5   : > { %v3710_v59 = vpop.xlane.xlu0 %3709 }
 0xcf6   : > { %v3714_v38 = vmul.f32 0.03125, %v3710_v59 }
 0xcf7   : > { %v3713_v39 = vpop.xlane.xlu1 %3712 }
 0xcf8   : > { %v3716_v11 = vadd.f32 1e-05, %v3714_v38  ;;  %v3715_v61 = vmul.f32 0.03125, %v3713_v39 }
 0xcfa   : > { %4670 = vrsqrt.f32 %v3716_v11  ;;  %v3717_v1 = vadd.f32 1e-05, %v3715_v61 }
 0xcfc   : > { %4672 = vrsqrt.f32 %v3717_v1 }
 0xd04   : > { %v4671_v13 = vpop.eup %4670 }
 0xd05   : > { %v3720_v16 = vmul.f32 %v4671_v13, %v3704_v53 }
 0xd06   : > { %v4673_v9 = vpop.eup %4672 }
 0xd07   : > { %v3728_v15 = vmul.f32 %v4204_v12, %v3720_v16  ;;  %v3721_v26 = vmul.f32 %v4673_v9, %v3705_v6  ;;  %3743 = sbr.rel (%p4206_p8) target bundleno = 3878 (0xf26), region = 80 }
 0xd09   : > { %v3736_v17 = vadd.f32 %v4205_v30, %v3728_v15  ;;  %v3729_v18 = vmul.f32 %v4204_v12, %v3721_v26 }
 0xd0b   : > { %3738 = vst.msk [vmem:[#allocation2] sm:$0xff] %vm697_vm5, %v3736_v17  ;;  %v3737_v56 = vadd.f32 %v4205_v30, %v3729_v18 }
 0xd0d   : > { %3739 = vst.msk [vmem:[#allocation2 + $0x8] sm:$0xff] %vm697_vm5, %v3737_v56  ;;  %v3748_v63 = vpack.c.bf16 (!%p4206_p8), %v3737_v56, %v3736_v17 }
 0xd0f   : > { %4507 = vmatmul.mubr.msk.bf16.vlgmr.msra.gmra.mrb[0].mxu0 %vm697_vm5, %v3748_v63 }
 0xde2   : > { %v3805_v55 = vpop.f32.mrb[0].mxu0 }
 0xde3   : > { %v3806_v21 = vadd.f32 %v4207_v51, %v3805_v55  ;;  %v4508_v52 = vpop.f32.mrb[1].mxu0 }
 0xde4   : > { %v3808_v23 = vpop.f32.mrb[2].mxu0 }
 0xde5   : > { %v3809_v24 = vadd.f32 %v4207_v51, %v3808_v23  ;;  %v4509_v29 = vpop.f32.mrb[3].mxu0  ;;  %v3813_v20 = vsel %vm3812_vm11, %v3806_v21, -inf  ;;  %v4211_v45 = vmul.f32 -1.442695, %v3806_v21 }
 0xde6   : > { %v3816_v36 = vsel %vm3815_vm12, %v3813_v20, -inf }
 0xde7   : > { %3817 = vmax.xlane.f32.xlu0 %v3816_v36  ;;  %v3814_v31 = vsel %vm3812_vm11, %v3809_v24, -inf  ;;  %v4212_v46 = vmul.f32 -1.442695, %v3809_v24 }
 0xde8   : > { %v3819_v32 = vsel %vm3815_vm12, %v3814_v31, -inf }
 0xdeb   : > { %3820 = vmax.xlane.f32.xlu0 %v3819_v32 }
 0xe74   : > { %v3818_v54 = vpop.xlane.xlu0 %3817 }
 0xe75   : > { %v3822_v57 = vsub.f32 %v3813_v20, %v3818_v54 }
 0xe77   : > { %v3824_v33 = vmul.f32 1.442695, %v3822_v57 }
 0xe78   : > { %v3821_v34 = vpop.xlane.xlu0 %3820 }
 0xe79   : > { %4676 = vpow2.f32 %v3824_v33  ;;  %v3823_v37 = vsub.f32 %v3814_v31, %v3821_v34 }
 0xe7b   : > { %v3826_v22 = vmul.f32 1.442695, %v3823_v37 }
 0xe7d   : > { %4678 = vpow2.f32 %v3826_v22 }
 0xe7e   : > { %4680 = vpow2.f32 %v4211_v45 }
 0xe7f   : > { %4682 = vpow2.f32 %v4212_v46 }
 0xe83   : > { %v4677_v40 = vpop.eup %4676 }
 0xe84   : > { %v3828_v4 = vsel %vm3815_vm12, %v4677_v40, 0.0 }
 0xe85   : > { %3829 = vadd.xlane.f32.xlu1 %v3828_v4 }
 0xe87   : > { %v4679_v41 = vpop.eup %4678 }
 0xe88   : > { %v3831_v43 = vsel %vm3815_vm12, %v4679_v41, 0.0  ;;  %v4681_v47 = vpop.eup %4680 }
 0xe89   : > { %3832 = vadd.xlane.f32.xlu1 %v3831_v43  ;;  %v3844_v48 = vadd.f32 1.0, %v4681_v47  ;;  %v4683_v49 = vpop.eup %4682 }
 0xe8a   : > { %v3845_v42 = vadd.f32 1.0, %v4683_v49 }
 0xf12   : > { %v3830_v35 = vpop.xlane.xlu1 %3829 }
 0xf13   : > { %4684 = vrcp.f32 %v3830_v35 }
 0xf14   : > { %4686 = vrcp.f32 %v3844_v48 }
 0xf16   : > { %v3833_v44 = vpop.xlane.xlu1 %3832 }
 0xf17   : > { %4688 = vrcp.f32 %v3833_v44 }
 0xf18   : > { %4690 = vrcp.f32 %v3845_v42 }
 0xf1d   : > { %v4685_v25 = vpop.eup %4684 }
 0xf1e   : > { %v3835_v50 = vmul.f32 %v4685_v25, %v4677_v40  ;;  %v4687_v60 = vpop.eup %4686 }
 0xf20   : > { %v3850_v62 = vsel %vm3812_vm11, %v3835_v50, %v4687_v60 }
 0xf21   : > { %v4689_v5 = vpop.eup %4688  ;;  %3852 = vst.msk [vmem:[%s5514_s12] sm:$0xff] %vm3815_vm12, %v3850_v62 }
 0xf22   : > { %v3837_v28 = vmul.f32 %v4689_v5, %v4679_v41  ;;  %v4691_v7 = vpop.eup %4690 }
 0xf24   : > { %v3851_v53 = vsel %vm3812_vm11, %v3837_v28, %v4691_v7 }
 0xf25   : > { %3853 = vst.msk [vmem:[%s5514_s12 + $0x8] sm:$0xff] %vm3815_vm12, %v3851_v53 }
 0xf26 PF: > { %s5534_s24 = sld [smem:[#allocation8_spill]]  ;;  %s5535_s21 = sld [smem:[#allocation6_spill]] }
 0xf27   : > { %s5536_s22 = sld [smem:[#allocation7_spill]]  ;;  %s5537_s23 = sld [smem:[#allocation9_spill]] }
 0xf2c   : > { %p22_p4 = scmp.ge.s32.totalorder %s5534_s24, 4  }
 0xf2e   :  { %24 = sbr.rel (!%p22_p4) target bundleno = 7 (0x7), region = 160 }
 0xf35   :  { %3865 = vsyncpa [#allocation4], 1 }
 0xf36   :  { %3867 = vsyncpa [#allocation4 + $0x1], 1 }

</bundles_post_ra>
